<compile_context>
chip_gen: v7x
topology: tpu7x:2x2x1
jax: 0.10.0
libtpu: 0.0.40
codegen_flags: <defaults>
</compile_context>

<pallas_src>
import jax
import jax.numpy as jnp
import numpy as np
from jax import lax
from jax.experimental import pallas as pl
from jax.experimental.pallas import tpu as pltpu


def attention_birnn_kernel(x_ref, wproj_ref, params_ref, bias_att_ref, mask_ref,
                           out_ref, a_ref, hout_ref):
    B, S, F = x_ref.shape                 # B = batch tile (B_t)
    w_proj = wproj_ref[...]               # (F, 8) bf16, gate columns interleaved fwd/bwd
    whh_col = params_ref[:, 0:1]          # (8, 1) recurrent weights (interleaved)
    b_col = params_ref[:, 1:2]            # (8, 1) gate bias (interleaved)
    bias_att = bias_att_ref[0, 0]         # scalar, read from SMEM

    # TODO(synk): nn.Dropout2d(0.2) is identity at inference (train-mode channel
    # dropout not modeled); nn.MaxPool1d is constructed but never used in forward().

    # ---- input->gate projection: single MXU pass, bf16 operands, f32 accumulation.
    gx2d = jnp.dot(x_ref[...].reshape(B * S, F).astype(jnp.bfloat16), w_proj,
                   preferred_element_type=jnp.float32)        # (B*S, 8)
    gx3 = gx2d.reshape(B, S, 8)

    # Gate-row helpers (rows interleaved [i_f,i_b,f_f,f_b,g_f,g_b,o_f,o_b]).
    row = lax.broadcasted_iota(jnp.int32, (8, 1), 0)
    is_bwd = (row % 2) == 1                                    # odd rows = backward dir
    # sigmoid(x) = 0.5*tanh(x/2)+0.5 -> pre-scale sigmoid rows by 0.5, tanh rows (g) by 1.
    gate_scale = jnp.where((row == 4) | (row == 5),
                           jnp.float32(1.0), jnp.float32(0.5))

    # Per-step gate blocks with batch on lanes: (8, B).  Bias + scale folded in once.
    # These only depend on the projection, not the carries, so the scheduler can
    # overlap them with the recurrence's EUP latency.
    gt = [(jnp.transpose(gx3[:, t, :]) + b_col) * gate_scale for t in range(S)]
    # Fused bidirectional stream: step t = forward time t (even rows) + backward
    # time S-1-t (odd rows).
    g_steps = [jnp.where(is_bwd, gt[S - 1 - t], gt[t]) for t in range(S)]

    # Hoisted recurrent-weight broadcast (JAX does not CSE broadcast_in_dim).
    whh_sb = jnp.broadcast_to(whh_col * gate_scale, (8, B))

    h8 = jnp.zeros((8, B), jnp.float32)    # [hf, hb] tiled across the 4 gates
    c2 = jnp.zeros((2, B), jnp.float32)    # [c_fwd; c_bwd]
    # S (step_dim) is small here; static Python unroll keeps all indices static.
    # TODO(synk): for S >~ 32 switch to lax.fori_loop(..., unroll=True) to bound
    # vreg live ranges.
    for t in range(S):
        g = g_steps[t] + h8 * whh_sb                 # pre-scaled gate pre-activations
        t8 = jnp.tanh(g)                             # EUP push 1 (all gates at once)
        sg = t8 * 0.5 + 0.5                          # sigmoid rows recovered on the VPU
        c2 = sg[2:4] * c2 + sg[0:2] * t8[4:6]        # f*c + i*g       (2, B)
        h2 = sg[6:8] * jnp.tanh(c2)                  # o*tanh(c); EUP push 2
        # row 0 = h_fwd at time t, row 1 = h_bwd at time S-1-t -> scratch stores
        hout_ref[t:t + 1, :] = h2[0:1, :]
        hout_ref[S + (S - 1 - t):S + (S - 1 - t) + 1, :] = h2[1:2, :]
        h8 = jnp.tile(h2, (4, 1))                    # interleave [hf,hb] over 4 gates

    # ---- attention weights: sum LSTM channels + bias, mask, softmax over S.
    hall = hout_ref[...]                                       # (2S, B)
    logits = jnp.transpose(hall[0:S, :] + hall[S:2 * S, :]) + bias_att   # (B, S)
    mask_b = mask_ref[...] != 0
    # a[~mask] = -inf  (a fully-masked row yields NaN, same as the PyTorch module)
    logits = jnp.where(mask_b, logits, -jnp.inf)
    m = jnp.max(logits, axis=1, keepdims=True)
    e = jnp.exp(logits - m)
    denom = jnp.sum(e, axis=1, keepdims=True)
    a = e * pl.reciprocal(denom, approx=True)                  # (B, S)
    a_ref[...] = a.astype(a_ref.dtype)

    # ---- out_max as a running max over S: no (B,S,F) weighted temp.
    # Masked steps contribute exactly x*0, matching torch.max over weighted_input.
    out = x_ref[:, 0, :].astype(jnp.float32) * a[:, 0:1]
    for s in range(1, S):
        out = jnp.maximum(out, x_ref[:, s, :].astype(jnp.float32) * a[:, s:s + 1])
    out_ref[...] = out.astype(out_ref.dtype)
    # TODO(synk): for callers that allow it, pad F to a multiple of 128 so the
    # (B_t, F) store is lane-dense (unmasked vst) instead of vst.msk.


# Row permutation so the projected gate columns come out interleaved by direction:
# [i_f, i_b, f_f, f_b, g_f, g_b, o_f, o_b]
_PERM = np.array([0, 4, 1, 5, 2, 6, 3, 7])


def _pick_batch_tile(B, max_tile=128):
    """Batch tile: multiple of 8 (BlockSpec sublane rule) dividing B, else whole B."""
    if B <= max_tile:
        return B
    for bt in range(max_tile, 7, -8):
        if B % bt == 0:
            return bt
    return B


@jax.jit
def attention_birnn(x, w_ih, w_hh, b, bias_att, mask):
    B, S, F = x.shape
    B_t = _pick_batch_tile(B)
    nb = B // B_t
    # Tiny weights: pre-transpose / interleave outside the kernel (pure layout).
    w_proj = jnp.transpose(w_ih[_PERM, :]).astype(jnp.bfloat16)                  # (F, 8)
    params = jnp.stack([w_hh.T.reshape(-1), b.T.reshape(-1)],
                       axis=1).astype(jnp.float32)                               # (8, 2)
    mask_i = mask.astype(jnp.int32)

    grid_spec = pltpu.PrefetchScalarGridSpec(
        num_scalar_prefetch=0,
        grid=(nb,),
        in_specs=[
            pl.BlockSpec((B_t, S, F), lambda i: (i, 0, 0)),          # x
            pl.BlockSpec((F, 8), lambda i: (0, 0)),                  # w_proj
            pl.BlockSpec((8, 2), lambda i: (0, 0)),                  # [w_hh | bias]
            pl.BlockSpec((1, 1), lambda i: (0, 0),
                         memory_space=pltpu.MemorySpace.SMEM),       # bias_att
            pl.BlockSpec((B_t, S), lambda i: (i, 0)),                # mask
        ],
        out_specs=(
            pl.BlockSpec((B_t, F), lambda i: (i, 0)),                # out_max
            pl.BlockSpec((B_t, S), lambda i: (i, 0)),                # a
        ),
        scratch_shapes=[pltpu.VMEM((2 * S, B_t), jnp.float32)],      # hidden outputs
    )

    out_max, a = pl.pallas_call(
        attention_birnn_kernel,
        out_shape=(jax.ShapeDtypeStruct((B, F), x.dtype),
                   jax.ShapeDtypeStruct((B, S), jnp.float32)),
        grid_spec=grid_spec,
        compiler_params=pltpu.CompilerParams(
            dimension_semantics=("parallel",),       # megacore batch sharding (v7x)
            vmem_limit_bytes=32 * 1024 * 1024),      # safe on v5e/v6e/v7x
    )(x, w_proj, params, bias_att.astype(jnp.float32), mask_i)
    return out_max, a


def attention_birnn_ref(x, w_ih, w_hh, b, bias_att, mask):
    """Pure-JAX reference with the same forward semantics.  The input projection
    applies the same bf16 operand rounding (f32 accumulation) as the kernel's
    single-pass MXU dot, so the comparison isolates kernel structure."""
    B, S, F = x.shape
    gx = jnp.einsum('bsf,gf->bsg', x.astype(jnp.bfloat16), w_ih.astype(jnp.bfloat16),
                    preferred_element_type=jnp.float32)
    gx_f = gx[..., 0:4] + b[0]
    gx_b = gx[..., 4:8] + b[1]

    def cell(g, h, c, whh):
        g = g + h * whh
        i = jax.nn.sigmoid(g[:, 0:1]); f = jax.nn.sigmoid(g[:, 1:2])
        gg = jnp.tanh(g[:, 2:3]); o = jax.nn.sigmoid(g[:, 3:4])
        c = f * c + i * gg
        h = o * jnp.tanh(c)
        return h, c

    hf = cf = jnp.zeros((B, 1), jnp.float32)
    outs_f = []
    for t in range(S):
        hf, cf = cell(gx_f[:, t, :], hf, cf, w_hh[0:1])
        outs_f.append(hf)
    hb = cb = jnp.zeros((B, 1), jnp.float32)
    outs_b = [None] * S
    for t in range(S - 1, -1, -1):
        hb, cb = cell(gx_b[:, t, :], hb, cb, w_hh[1:2])
        outs_b[t] = hb

    a = jnp.concatenate([outs_f[t] + outs_b[t] for t in range(S)], axis=1)
    a = a + bias_att[0, 0]
    a = jnp.where(mask, a, -jnp.inf)
    a = jax.nn.softmax(a, axis=1)
    w = x * a[:, :, None]
    return jnp.max(w, axis=1), a


if __name__ == "__main__":
    B, S, F = 2, 8, 32   # batch, step_dim, feature_dim

    key = jax.random.PRNGKey(0)
    k1, k2, k3, k4 = jax.random.split(key, 4)
    x = jax.random.normal(k1, (B, S, F), jnp.float32)
    # PyTorch LSTM init: uniform(-1/sqrt(hidden), 1/sqrt(hidden)) = U(-1, 1) for hidden=1.
    w_ih = jax.random.uniform(k2, (8, F), jnp.float32, -1.0, 1.0)
    w_hh = jax.random.uniform(k3, (2, 4), jnp.float32, -1.0, 1.0)
    b = jax.random.uniform(k4, (2, 4), jnp.float32, -1.0, 1.0)
    bias_att = jnp.zeros((1, 1), jnp.float32)
    mask = jnp.array([[1, 1, 1, 1, 1, 1, 0, 0],
                      [1, 1, 1, 1, 1, 1, 1, 1]], dtype=bool)

    out_max, a = attention_birnn(x, w_ih, w_hh, b, bias_att, mask)
    jax.block_until_ready((out_max, a))

    ref_max, ref_a = attention_birnn_ref(x, w_ih, w_hh, b, bias_att, mask)
    # Tolerance covers the approx-reciprocal softmax and tanh-based sigmoid (EUP).
    np.testing.assert_allclose(np.asarray(out_max), np.asarray(ref_max),
                               atol=2e-3, rtol=2e-3)
    np.testing.assert_allclose(np.asarray(a), np.asarray(ref_a),
                               atol=2e-3, rtol=2e-3)
    print("KERNEL_OK")
</pallas_src>

<mosaic_0001>
module attributes {stable_mosaic.version = 11 : i64} {
  func.func @attention_birnn_kernel(%arg0: i32, %arg1: memref<2x8x32xf32, #tpu.memory_space<vmem>>, %arg2: memref<32x8xbf16, #tpu.memory_space<vmem>>, %arg3: memref<8x2xf32, #tpu.memory_space<vmem>>, %arg4: memref<1x1xf32, #tpu.memory_space<smem>>, %arg5: memref<2x8xi32, #tpu.memory_space<vmem>>, %arg6: memref<2x32xf32, #tpu.memory_space<vmem>>, %arg7: memref<2x8xf32, #tpu.memory_space<vmem>>, %arg8: memref<16x2xf32, #tpu.memory_space<vmem>>) attributes {dimension_semantics = [#tpu.dimension_semantics<parallel>], iteration_bounds = array<i64: 1>, scalar_prefetch = 0 : i64, scratch_operands = 1 : i64, tpu.core_type = #tpu.core_type<tc>, window_params = [{transform_indices = @transform_0, window_bounds = array<i64: 2, 8, 32>}, {pipeline_mode = #tpu.pipeline_mode<synchronous>, transform_indices = @transform_1, window_bounds = array<i64: 32, 8>}, {pipeline_mode = #tpu.pipeline_mode<synchronous>, transform_indices = @transform_2, window_bounds = array<i64: 8, 2>}, {transform_indices = @transform_3, window_bounds = array<i64: 1, 1>}, {transform_indices = @transform_4, window_bounds = array<i64: 2, 8>}, {transform_indices = @transform_5, window_bounds = array<i64: 2, 32>}, {transform_indices = @transform_6, window_bounds = array<i64: 2, 8>}]} {
    %c0 = arith.constant 0 : index
    %c0_0 = arith.constant 0 : index
    %0 = vector.load %arg2[%c0, %c0_0] : memref<32x8xbf16, #tpu.memory_space<vmem>>, vector<32x8xbf16>
    %c0_1 = arith.constant 0 : index
    %c0_2 = arith.constant 0 : index
    %1 = vector.load %arg3[%c0_1, %c0_2] : memref<8x2xf32, #tpu.memory_space<vmem>>, vector<8x1xf32>
    %c0_3 = arith.constant 0 : index
    %c1 = arith.constant 1 : index
    %2 = vector.load %arg3[%c0_3, %c1] : memref<8x2xf32, #tpu.memory_space<vmem>>, vector<8x1xf32>
    %c0_4 = arith.constant 0 : index
    %c0_5 = arith.constant 0 : index
    %3 = memref.load %arg4[%c0_4, %c0_5] : memref<1x1xf32, #tpu.memory_space<smem>>
    %c0_6 = arith.constant 0 : index
    %c0_7 = arith.constant 0 : index
    %c0_8 = arith.constant 0 : index
    %4 = vector.load %arg1[%c0_6, %c0_7, %c0_8] : memref<2x8x32xf32, #tpu.memory_space<vmem>>, vector<2x8x32xf32>
    %5 = vector.shape_cast %4 : vector<2x8x32xf32> to vector<16x32xf32>
    %6 = arith.truncf %5 : vector<16x32xf32> to vector<16x32xbf16>
    %cst = arith.constant dense<0.000000e+00> : vector<16x8xf32>
    %7 = tpu.matmul %6, %0, %cst {dimension_numbers = #tpu.dot_dimension_numbers<[1], [0], [0], [1], [0, 0, 1, 1], [], []>} : vector<16x32xbf16>, vector<32x8xbf16>, vector<16x8xf32> -> vector<16x8xf32>
    %8 = vector.shape_cast %7 : vector<16x8xf32> to vector<2x8x8xf32>
    %9 = tpu.iota {dimensions = array<i32: 0>} : vector<8x1xi32>
    %c2_i32 = arith.constant 2 : i32
    %c0_i32 = arith.constant 0 : i32
    %10 = arith.cmpi eq, %c2_i32, %c0_i32 : i32
    %c1_i32 = arith.constant 1 : i32
    %11 = arith.select %10, %c1_i32, %c2_i32 : i32
    %12 = vector.broadcast %11 : i32 to vector<8x1xi32>
    %13 = arith.remsi %9, %12 : vector<8x1xi32>
    %c0_i32_9 = arith.constant 0 : i32
    %14 = vector.broadcast %c0_i32_9 : i32 to vector<8x1xi32>
    %15 = arith.cmpi ne, %13, %14 : vector<8x1xi32>
    %c0_i32_10 = arith.constant 0 : i32
    %16 = vector.broadcast %c0_i32_10 : i32 to vector<8x1xi32>
    %17 = arith.cmpi slt, %13, %16 : vector<8x1xi32>
    %c0_i32_11 = arith.constant 0 : i32
    %18 = arith.cmpi slt, %11, %c0_i32_11 : i32
    %19 = vector.broadcast %18 : i1 to vector<8x1xi1>
    %20 = vector.broadcast %19 : vector<8x1xi1> to vector<8x1xi1>
    %21 = arith.xori %17, %20 : vector<8x1xi1>
    %22 = arith.andi %21, %15 : vector<8x1xi1>
    %23 = vector.broadcast %11 : i32 to vector<8x1xi32>
    %24 = arith.addi %13, %23 : vector<8x1xi32>
    %25 = arith.select %22, %24, %13 : vector<8x1xi1>, vector<8x1xi32>
    %c1_i32_12 = arith.constant 1 : i32
    %26 = vector.broadcast %c1_i32_12 : i32 to vector<8x1xi32>
    %27 = arith.cmpi eq, %25, %26 : vector<8x1xi32>
    %c4_i32 = arith.constant 4 : i32
    %28 = vector.broadcast %c4_i32 : i32 to vector<8x1xi32>
    %29 = arith.cmpi eq, %9, %28 : vector<8x1xi32>
    %c5_i32 = arith.constant 5 : i32
    %30 = vector.broadcast %c5_i32 : i32 to vector<8x1xi32>
    %31 = arith.cmpi eq, %9, %30 : vector<8x1xi32>
    %32 = arith.ori %29, %31 : vector<8x1xi1>
    %cst_13 = arith.constant 1.000000e+00 : f32
    %cst_14 = arith.constant 5.000000e-01 : f32
    %33 = vector.broadcast %cst_13 : f32 to vector<8x1xf32>
    %34 = vector.broadcast %cst_14 : f32 to vector<8x1xf32>
    %35 = arith.select %32, %33, %34 : vector<8x1xi1>, vector<8x1xf32>
    %36 = vector.extract_strided_slice %8 {offsets = [0, 0, 0], sizes = [2, 1, 8], strides = [1, 1, 1]} : vector<2x8x8xf32> to vector<2x1x8xf32>
    %37 = vector.shape_cast %36 : vector<2x1x8xf32> to vector<2x8xf32>
    %38 = tpu.transpose %37, [1, 0] : vector<2x8xf32> -> vector<8x2xf32>
    %39 = vector.broadcast %2 : vector<8x1xf32> to vector<8x2xf32>
    %40 = arith.addf %38, %39 : vector<8x2xf32>
    %41 = vector.broadcast %35 : vector<8x1xf32> to vector<8x2xf32>
    %42 = arith.mulf %40, %41 : vector<8x2xf32>
    %43 = vector.extract_strided_slice %8 {offsets = [0, 1, 0], sizes = [2, 1, 8], strides = [1, 1, 1]} : vector<2x8x8xf32> to vector<2x1x8xf32>
    %44 = vector.shape_cast %43 : vector<2x1x8xf32> to vector<2x8xf32>
    %45 = tpu.transpose %44, [1, 0] : vector<2x8xf32> -> vector<8x2xf32>
    %46 = vector.broadcast %2 : vector<8x1xf32> to vector<8x2xf32>
    %47 = arith.addf %45, %46 : vector<8x2xf32>
    %48 = vector.broadcast %35 : vector<8x1xf32> to vector<8x2xf32>
    %49 = arith.mulf %47, %48 : vector<8x2xf32>
    %50 = vector.extract_strided_slice %8 {offsets = [0, 2, 0], sizes = [2, 1, 8], strides = [1, 1, 1]} : vector<2x8x8xf32> to vector<2x1x8xf32>
    %51 = vector.shape_cast %50 : vector<2x1x8xf32> to vector<2x8xf32>
    %52 = tpu.transpose %51, [1, 0] : vector<2x8xf32> -> vector<8x2xf32>
    %53 = vector.broadcast %2 : vector<8x1xf32> to vector<8x2xf32>
    %54 = arith.addf %52, %53 : vector<8x2xf32>
    %55 = vector.broadcast %35 : vector<8x1xf32> to vector<8x2xf32>
    %56 = arith.mulf %54, %55 : vector<8x2xf32>
    %57 = vector.extract_strided_slice %8 {offsets = [0, 3, 0], sizes = [2, 1, 8], strides = [1, 1, 1]} : vector<2x8x8xf32> to vector<2x1x8xf32>
    %58 = vector.shape_cast %57 : vector<2x1x8xf32> to vector<2x8xf32>
    %59 = tpu.transpose %58, [1, 0] : vector<2x8xf32> -> vector<8x2xf32>
    %60 = vector.broadcast %2 : vector<8x1xf32> to vector<8x2xf32>
    %61 = arith.addf %59, %60 : vector<8x2xf32>
    %62 = vector.broadcast %35 : vector<8x1xf32> to vector<8x2xf32>
    %63 = arith.mulf %61, %62 : vector<8x2xf32>
    %64 = vector.extract_strided_slice %8 {offsets = [0, 4, 0], sizes = [2, 1, 8], strides = [1, 1, 1]} : vector<2x8x8xf32> to vector<2x1x8xf32>
    %65 = vector.shape_cast %64 : vector<2x1x8xf32> to vector<2x8xf32>
    %66 = tpu.transpose %65, [1, 0] : vector<2x8xf32> -> vector<8x2xf32>
    %67 = vector.broadcast %2 : vector<8x1xf32> to vector<8x2xf32>
    %68 = arith.addf %66, %67 : vector<8x2xf32>
    %69 = vector.broadcast %35 : vector<8x1xf32> to vector<8x2xf32>
    %70 = arith.mulf %68, %69 : vector<8x2xf32>
    %71 = vector.extract_strided_slice %8 {offsets = [0, 5, 0], sizes = [2, 1, 8], strides = [1, 1, 1]} : vector<2x8x8xf32> to vector<2x1x8xf32>
    %72 = vector.shape_cast %71 : vector<2x1x8xf32> to vector<2x8xf32>
    %73 = tpu.transpose %72, [1, 0] : vector<2x8xf32> -> vector<8x2xf32>
    %74 = vector.broadcast %2 : vector<8x1xf32> to vector<8x2xf32>
    %75 = arith.addf %73, %74 : vector<8x2xf32>
    %76 = vector.broadcast %35 : vector<8x1xf32> to vector<8x2xf32>
    %77 = arith.mulf %75, %76 : vector<8x2xf32>
    %78 = vector.extract_strided_slice %8 {offsets = [0, 6, 0], sizes = [2, 1, 8], strides = [1, 1, 1]} : vector<2x8x8xf32> to vector<2x1x8xf32>
    %79 = vector.shape_cast %78 : vector<2x1x8xf32> to vector<2x8xf32>
    %80 = tpu.transpose %79, [1, 0] : vector<2x8xf32> -> vector<8x2xf32>
    %81 = vector.broadcast %2 : vector<8x1xf32> to vector<8x2xf32>
    %82 = arith.addf %80, %81 : vector<8x2xf32>
    %83 = vector.broadcast %35 : vector<8x1xf32> to vector<8x2xf32>
    %84 = arith.mulf %82, %83 : vector<8x2xf32>
    %85 = vector.extract_strided_slice %8 {offsets = [0, 7, 0], sizes = [2, 1, 8], strides = [1, 1, 1]} : vector<2x8x8xf32> to vector<2x1x8xf32>
    %86 = vector.shape_cast %85 : vector<2x1x8xf32> to vector<2x8xf32>
    %87 = tpu.transpose %86, [1, 0] : vector<2x8xf32> -> vector<8x2xf32>
    %88 = vector.broadcast %2 : vector<8x1xf32> to vector<8x2xf32>
    %89 = arith.addf %87, %88 : vector<8x2xf32>
    %90 = vector.broadcast %35 : vector<8x1xf32> to vector<8x2xf32>
    %91 = arith.mulf %89, %90 : vector<8x2xf32>
    %92 = vector.shape_cast %27 : vector<8x1xi1> to vector<8x1xi1>
    %93 = vector.broadcast %92 : vector<8x1xi1> to vector<8x2xi1>
    %94 = arith.select %93, %91, %42 : vector<8x2xi1>, vector<8x2xf32>
    %95 = vector.shape_cast %27 : vector<8x1xi1> to vector<8x1xi1>
    %96 = vector.broadcast %95 : vector<8x1xi1> to vector<8x2xi1>
    %97 = arith.select %96, %84, %49 : vector<8x2xi1>, vector<8x2xf32>
    %98 = vector.shape_cast %27 : vector<8x1xi1> to vector<8x1xi1>
    %99 = vector.broadcast %98 : vector<8x1xi1> to vector<8x2xi1>
    %100 = arith.select %99, %77, %56 : vector<8x2xi1>, vector<8x2xf32>
    %101 = vector.shape_cast %27 : vector<8x1xi1> to vector<8x1xi1>
    %102 = vector.broadcast %101 : vector<8x1xi1> to vector<8x2xi1>
    %103 = arith.select %102, %70, %63 : vector<8x2xi1>, vector<8x2xf32>
    %104 = vector.shape_cast %27 : vector<8x1xi1> to vector<8x1xi1>
    %105 = vector.broadcast %104 : vector<8x1xi1> to vector<8x2xi1>
    %106 = arith.select %105, %63, %70 : vector<8x2xi1>, vector<8x2xf32>
    %107 = vector.shape_cast %27 : vector<8x1xi1> to vector<8x1xi1>
    %108 = vector.broadcast %107 : vector<8x1xi1> to vector<8x2xi1>
    %109 = arith.select %108, %56, %77 : vector<8x2xi1>, vector<8x2xf32>
    %110 = vector.shape_cast %27 : vector<8x1xi1> to vector<8x1xi1>
    %111 = vector.broadcast %110 : vector<8x1xi1> to vector<8x2xi1>
    %112 = arith.select %111, %49, %84 : vector<8x2xi1>, vector<8x2xf32>
    %113 = vector.shape_cast %27 : vector<8x1xi1> to vector<8x1xi1>
    %114 = vector.broadcast %113 : vector<8x1xi1> to vector<8x2xi1>
    %115 = arith.select %114, %42, %91 : vector<8x2xi1>, vector<8x2xf32>
    %116 = arith.mulf %1, %35 : vector<8x1xf32>
    %117 = vector.shape_cast %116 : vector<8x1xf32> to vector<8x1xf32>
    %118 = vector.broadcast %117 : vector<8x1xf32> to vector<8x2xf32>
    %cst_15 = arith.constant 0.000000e+00 : f32
    %119 = vector.broadcast %cst_15 : f32 to vector<8x2xf32>
    %cst_16 = arith.constant 0.000000e+00 : f32
    %120 = vector.broadcast %cst_16 : f32 to vector<2x2xf32>
    %121 = arith.mulf %119, %118 : vector<8x2xf32>
    %122 = arith.addf %94, %121 : vector<8x2xf32>
    %123 = math.tanh %122 : vector<8x2xf32>
    %cst_17 = arith.constant 5.000000e-01 : f32
    %124 = vector.broadcast %cst_17 : f32 to vector<8x2xf32>
    %125 = arith.mulf %123, %124 : vector<8x2xf32>
    %cst_18 = arith.constant 5.000000e-01 : f32
    %126 = vector.broadcast %cst_18 : f32 to vector<8x2xf32>
    %127 = arith.addf %125, %126 : vector<8x2xf32>
    %128 = vector.extract_strided_slice %127 {offsets = [2, 0], sizes = [2, 2], strides = [1, 1]} : vector<8x2xf32> to vector<2x2xf32>
    %129 = arith.mulf %128, %120 : vector<2x2xf32>
    %130 = vector.extract_strided_slice %127 {offsets = [0, 0], sizes = [2, 2], strides = [1, 1]} : vector<8x2xf32> to vector<2x2xf32>
    %131 = vector.extract_strided_slice %123 {offsets = [4, 0], sizes = [2, 2], strides = [1, 1]} : vector<8x2xf32> to vector<2x2xf32>
    %132 = arith.mulf %130, %131 : vector<2x2xf32>
    %133 = arith.addf %129, %132 : vector<2x2xf32>
    %134 = vector.extract_strided_slice %127 {offsets = [6, 0], sizes = [2, 2], strides = [1, 1]} : vector<8x2xf32> to vector<2x2xf32>
    %135 = math.tanh %133 : vector<2x2xf32>
    %136 = arith.mulf %134, %135 : vector<2x2xf32>
    %137 = vector.extract_strided_slice %136 {offsets = [0, 0], sizes = [1, 2], strides = [1, 1]} : vector<2x2xf32> to vector<1x2xf32>
    %c0_19 = arith.constant 0 : index
    %c0_20 = arith.constant 0 : index
    %138 = vector.load %arg8[%c0_19, %c0_20] : memref<16x2xf32, #tpu.memory_space<vmem>>, vector<1x2xf32>
    tpu.vector_store %arg8[%c0_19, %c0_20], %137 {strides = array<i32>} : memref<16x2xf32, #tpu.memory_space<vmem>>, vector<1x2xf32>,
    %139 = vector.extract_strided_slice %136 {offsets = [1, 0], sizes = [1, 2], strides = [1, 1]} : vector<2x2xf32> to vector<1x2xf32>
    %c15 = arith.constant 15 : index
    %c0_21 = arith.constant 0 : index
    %140 = vector.load %arg8[%c15, %c0_21] : memref<16x2xf32, #tpu.memory_space<vmem>>, vector<1x2xf32>
    tpu.vector_store %arg8[%c15, %c0_21], %139 {strides = array<i32>} : memref<16x2xf32, #tpu.memory_space<vmem>>, vector<1x2xf32>,
    %141 = tpu.concatenate %136, %136, %136, %136 in 0 : vector<2x2xf32>, vector<2x2xf32>, vector<2x2xf32>, vector<2x2xf32> -> vector<8x2xf32>
    %142 = arith.mulf %141, %118 : vector<8x2xf32>
    %143 = arith.addf %97, %142 : vector<8x2xf32>
    %144 = math.tanh %143 : vector<8x2xf32>
    %cst_22 = arith.constant 5.000000e-01 : f32
    %145 = vector.broadcast %cst_22 : f32 to vector<8x2xf32>
    %146 = arith.mulf %144, %145 : vector<8x2xf32>
    %cst_23 = arith.constant 5.000000e-01 : f32
    %147 = vector.broadcast %cst_23 : f32 to vector<8x2xf32>
    %148 = arith.addf %146, %147 : vector<8x2xf32>
    %149 = vector.extract_strided_slice %148 {offsets = [2, 0], sizes = [2, 2], strides = [1, 1]} : vector<8x2xf32> to vector<2x2xf32>
    %150 = arith.mulf %149, %133 : vector<2x2xf32>
    %151 = vector.extract_strided_slice %148 {offsets = [0, 0], sizes = [2, 2], strides = [1, 1]} : vector<8x2xf32> to vector<2x2xf32>
    %152 = vector.extract_strided_slice %144 {offsets = [4, 0], sizes = [2, 2], strides = [1, 1]} : vector<8x2xf32> to vector<2x2xf32>
    %153 = arith.mulf %151, %152 : vector<2x2xf32>
    %154 = arith.addf %150, %153 : vector<2x2xf32>
    %155 = vector.extract_strided_slice %148 {offsets = [6, 0], sizes = [2, 2], strides = [1, 1]} : vector<8x2xf32> to vector<2x2xf32>
    %156 = math.tanh %154 : vector<2x2xf32>
    %157 = arith.mulf %155, %156 : vector<2x2xf32>
    %158 = vector.extract_strided_slice %157 {offsets = [0, 0], sizes = [1, 2], strides = [1, 1]} : vector<2x2xf32> to vector<1x2xf32>
    %c1_24 = arith.constant 1 : index
    %c0_25 = arith.constant 0 : index
    %159 = vector.load %arg8[%c1_24, %c0_25] : memref<16x2xf32, #tpu.memory_space<vmem>>, vector<1x2xf32>
    tpu.vector_store %arg8[%c1_24, %c0_25], %158 {strides = array<i32>} : memref<16x2xf32, #tpu.memory_space<vmem>>, vector<1x2xf32>,
    %160 = vector.extract_strided_slice %157 {offsets = [1, 0], sizes = [1, 2], strides = [1, 1]} : vector<2x2xf32> to vector<1x2xf32>
    %c14 = arith.constant 14 : index
    %c0_26 = arith.constant 0 : index
    %161 = vector.load %arg8[%c14, %c0_26] : memref<16x2xf32, #tpu.memory_space<vmem>>, vector<1x2xf32>
    tpu.vector_store %arg8[%c14, %c0_26], %160 {strides = array<i32>} : memref<16x2xf32, #tpu.memory_space<vmem>>, vector<1x2xf32>,
    %162 = tpu.concatenate %157, %157, %157, %157 in 0 : vector<2x2xf32>, vector<2x2xf32>, vector<2x2xf32>, vector<2x2xf32> -> vector<8x2xf32>
    %163 = arith.mulf %162, %118 : vector<8x2xf32>
    %164 = arith.addf %100, %163 : vector<8x2xf32>
    %165 = math.tanh %164 : vector<8x2xf32>
    %cst_27 = arith.constant 5.000000e-01 : f32
    %166 = vector.broadcast %cst_27 : f32 to vector<8x2xf32>
    %167 = arith.mulf %165, %166 : vector<8x2xf32>
    %cst_28 = arith.constant 5.000000e-01 : f32
    %168 = vector.broadcast %cst_28 : f32 to vector<8x2xf32>
    %169 = arith.addf %167, %168 : vector<8x2xf32>
    %170 = vector.extract_strided_slice %169 {offsets = [2, 0], sizes = [2, 2], strides = [1, 1]} : vector<8x2xf32> to vector<2x2xf32>
    %171 = arith.mulf %170, %154 : vector<2x2xf32>
    %172 = vector.extract_strided_slice %169 {offsets = [0, 0], sizes = [2, 2], strides = [1, 1]} : vector<8x2xf32> to vector<2x2xf32>
    %173 = vector.extract_strided_slice %165 {offsets = [4, 0], sizes = [2, 2], strides = [1, 1]} : vector<8x2xf32> to vector<2x2xf32>
    %174 = arith.mulf %172, %173 : vector<2x2xf32>
    %175 = arith.addf %171, %174 : vector<2x2xf32>
    %176 = vector.extract_strided_slice %169 {offsets = [6, 0], sizes = [2, 2], strides = [1, 1]} : vector<8x2xf32> to vector<2x2xf32>
    %177 = math.tanh %175 : vector<2x2xf32>
    %178 = arith.mulf %176, %177 : vector<2x2xf32>
    %179 = vector.extract_strided_slice %178 {offsets = [0, 0], sizes = [1, 2], strides = [1, 1]} : vector<2x2xf32> to vector<1x2xf32>
    %c2 = arith.constant 2 : index
    %c0_29 = arith.constant 0 : index
    %180 = vector.load %arg8[%c2, %c0_29] : memref<16x2xf32, #tpu.memory_space<vmem>>, vector<1x2xf32>
    tpu.vector_store %arg8[%c2, %c0_29], %179 {strides = array<i32>} : memref<16x2xf32, #tpu.memory_space<vmem>>, vector<1x2xf32>,
    %181 = vector.extract_strided_slice %178 {offsets = [1, 0], sizes = [1, 2], strides = [1, 1]} : vector<2x2xf32> to vector<1x2xf32>
    %c13 = arith.constant 13 : index
    %c0_30 = arith.constant 0 : index
    %182 = vector.load %arg8[%c13, %c0_30] : memref<16x2xf32, #tpu.memory_space<vmem>>, vector<1x2xf32>
    tpu.vector_store %arg8[%c13, %c0_30], %181 {strides = array<i32>} : memref<16x2xf32, #tpu.memory_space<vmem>>, vector<1x2xf32>,
    %183 = tpu.concatenate %178, %178, %178, %178 in 0 : vector<2x2xf32>, vector<2x2xf32>, vector<2x2xf32>, vector<2x2xf32> -> vector<8x2xf32>
    %184 = arith.mulf %183, %118 : vector<8x2xf32>
    %185 = arith.addf %103, %184 : vector<8x2xf32>
    %186 = math.tanh %185 : vector<8x2xf32>
    %cst_31 = arith.constant 5.000000e-01 : f32
    %187 = vector.broadcast %cst_31 : f32 to vector<8x2xf32>
    %188 = arith.mulf %186, %187 : vector<8x2xf32>
    %cst_32 = arith.constant 5.000000e-01 : f32
    %189 = vector.broadcast %cst_32 : f32 to vector<8x2xf32>
    %190 = arith.addf %188, %189 : vector<8x2xf32>
    %191 = vector.extract_strided_slice %190 {offsets = [2, 0], sizes = [2, 2], strides = [1, 1]} : vector<8x2xf32> to vector<2x2xf32>
    %192 = arith.mulf %191, %175 : vector<2x2xf32>
    %193 = vector.extract_strided_slice %190 {offsets = [0, 0], sizes = [2, 2], strides = [1, 1]} : vector<8x2xf32> to vector<2x2xf32>
    %194 = vector.extract_strided_slice %186 {offsets = [4, 0], sizes = [2, 2], strides = [1, 1]} : vector<8x2xf32> to vector<2x2xf32>
    %195 = arith.mulf %193, %194 : vector<2x2xf32>
    %196 = arith.addf %192, %195 : vector<2x2xf32>
    %197 = vector.extract_strided_slice %190 {offsets = [6, 0], sizes = [2, 2], strides = [1, 1]} : vector<8x2xf32> to vector<2x2xf32>
    %198 = math.tanh %196 : vector<2x2xf32>
    %199 = arith.mulf %197, %198 : vector<2x2xf32>
    %200 = vector.extract_strided_slice %199 {offsets = [0, 0], sizes = [1, 2], strides = [1, 1]} : vector<2x2xf32> to vector<1x2xf32>
    %c3 = arith.constant 3 : index
    %c0_33 = arith.constant 0 : index
    %201 = vector.load %arg8[%c3, %c0_33] : memref<16x2xf32, #tpu.memory_space<vmem>>, vector<1x2xf32>
    tpu.vector_store %arg8[%c3, %c0_33], %200 {strides = array<i32>} : memref<16x2xf32, #tpu.memory_space<vmem>>, vector<1x2xf32>,
    %202 = vector.extract_strided_slice %199 {offsets = [1, 0], sizes = [1, 2], strides = [1, 1]} : vector<2x2xf32> to vector<1x2xf32>
    %c12 = arith.constant 12 : index
    %c0_34 = arith.constant 0 : index
    %203 = vector.load %arg8[%c12, %c0_34] : memref<16x2xf32, #tpu.memory_space<vmem>>, vector<1x2xf32>
    tpu.vector_store %arg8[%c12, %c0_34], %202 {strides = array<i32>} : memref<16x2xf32, #tpu.memory_space<vmem>>, vector<1x2xf32>,
    %204 = tpu.concatenate %199, %199, %199, %199 in 0 : vector<2x2xf32>, vector<2x2xf32>, vector<2x2xf32>, vector<2x2xf32> -> vector<8x2xf32>
    %205 = arith.mulf %204, %118 : vector<8x2xf32>
    %206 = arith.addf %106, %205 : vector<8x2xf32>
    %207 = math.tanh %206 : vector<8x2xf32>
    %cst_35 = arith.constant 5.000000e-01 : f32
    %208 = vector.broadcast %cst_35 : f32 to vector<8x2xf32>
    %209 = arith.mulf %207, %208 : vector<8x2xf32>
    %cst_36 = arith.constant 5.000000e-01 : f32
    %210 = vector.broadcast %cst_36 : f32 to vector<8x2xf32>
    %211 = arith.addf %209, %210 : vector<8x2xf32>
    %212 = vector.extract_strided_slice %211 {offsets = [2, 0], sizes = [2, 2], strides = [1, 1]} : vector<8x2xf32> to vector<2x2xf32>
    %213 = arith.mulf %212, %196 : vector<2x2xf32>
    %214 = vector.extract_strided_slice %211 {offsets = [0, 0], sizes = [2, 2], strides = [1, 1]} : vector<8x2xf32> to vector<2x2xf32>
    %215 = vector.extract_strided_slice %207 {offsets = [4, 0], sizes = [2, 2], strides = [1, 1]} : vector<8x2xf32> to vector<2x2xf32>
    %216 = arith.mulf %214, %215 : vector<2x2xf32>
    %217 = arith.addf %213, %216 : vector<2x2xf32>
    %218 = vector.extract_strided_slice %211 {offsets = [6, 0], sizes = [2, 2], strides = [1, 1]} : vector<8x2xf32> to vector<2x2xf32>
    %219 = math.tanh %217 : vector<2x2xf32>
    %220 = arith.mulf %218, %219 : vector<2x2xf32>
    %221 = vector.extract_strided_slice %220 {offsets = [0, 0], sizes = [1, 2], strides = [1, 1]} : vector<2x2xf32> to vector<1x2xf32>
    %c4 = arith.constant 4 : index
    %c0_37 = arith.constant 0 : index
    %222 = vector.load %arg8[%c4, %c0_37] : memref<16x2xf32, #tpu.memory_space<vmem>>, vector<1x2xf32>
    tpu.vector_store %arg8[%c4, %c0_37], %221 {strides = array<i32>} : memref<16x2xf32, #tpu.memory_space<vmem>>, vector<1x2xf32>,
    %223 = vector.extract_strided_slice %220 {offsets = [1, 0], sizes = [1, 2], strides = [1, 1]} : vector<2x2xf32> to vector<1x2xf32>
    %c11 = arith.constant 11 : index
    %c0_38 = arith.constant 0 : index
    %224 = vector.load %arg8[%c11, %c0_38] : memref<16x2xf32, #tpu.memory_space<vmem>>, vector<1x2xf32>
    tpu.vector_store %arg8[%c11, %c0_38], %223 {strides = array<i32>} : memref<16x2xf32, #tpu.memory_space<vmem>>, vector<1x2xf32>,
    %225 = tpu.concatenate %220, %220, %220, %220 in 0 : vector<2x2xf32>, vector<2x2xf32>, vector<2x2xf32>, vector<2x2xf32> -> vector<8x2xf32>
    %226 = arith.mulf %225, %118 : vector<8x2xf32>
    %227 = arith.addf %109, %226 : vector<8x2xf32>
    %228 = math.tanh %227 : vector<8x2xf32>
    %cst_39 = arith.constant 5.000000e-01 : f32
    %229 = vector.broadcast %cst_39 : f32 to vector<8x2xf32>
    %230 = arith.mulf %228, %229 : vector<8x2xf32>
    %cst_40 = arith.constant 5.000000e-01 : f32
    %231 = vector.broadcast %cst_40 : f32 to vector<8x2xf32>
    %232 = arith.addf %230, %231 : vector<8x2xf32>
    %233 = vector.extract_strided_slice %232 {offsets = [2, 0], sizes = [2, 2], strides = [1, 1]} : vector<8x2xf32> to vector<2x2xf32>
    %234 = arith.mulf %233, %217 : vector<2x2xf32>
    %235 = vector.extract_strided_slice %232 {offsets = [0, 0], sizes = [2, 2], strides = [1, 1]} : vector<8x2xf32> to vector<2x2xf32>
    %236 = vector.extract_strided_slice %228 {offsets = [4, 0], sizes = [2, 2], strides = [1, 1]} : vector<8x2xf32> to vector<2x2xf32>
    %237 = arith.mulf %235, %236 : vector<2x2xf32>
    %238 = arith.addf %234, %237 : vector<2x2xf32>
    %239 = vector.extract_strided_slice %232 {offsets = [6, 0], sizes = [2, 2], strides = [1, 1]} : vector<8x2xf32> to vector<2x2xf32>
    %240 = math.tanh %238 : vector<2x2xf32>
    %241 = arith.mulf %239, %240 : vector<2x2xf32>
    %242 = vector.extract_strided_slice %241 {offsets = [0, 0], sizes = [1, 2], strides = [1, 1]} : vector<2x2xf32> to vector<1x2xf32>
    %c5 = arith.constant 5 : index
    %c0_41 = arith.constant 0 : index
    %243 = vector.load %arg8[%c5, %c0_41] : memref<16x2xf32, #tpu.memory_space<vmem>>, vector<1x2xf32>
    tpu.vector_store %arg8[%c5, %c0_41], %242 {strides = array<i32>} : memref<16x2xf32, #tpu.memory_space<vmem>>, vector<1x2xf32>,
    %244 = vector.extract_strided_slice %241 {offsets = [1, 0], sizes = [1, 2], strides = [1, 1]} : vector<2x2xf32> to vector<1x2xf32>
    %c10 = arith.constant 10 : index
    %c0_42 = arith.constant 0 : index
    %245 = vector.load %arg8[%c10, %c0_42] : memref<16x2xf32, #tpu.memory_space<vmem>>, vector<1x2xf32>
    tpu.vector_store %arg8[%c10, %c0_42], %244 {strides = array<i32>} : memref<16x2xf32, #tpu.memory_space<vmem>>, vector<1x2xf32>,
    %246 = tpu.concatenate %241, %241, %241, %241 in 0 : vector<2x2xf32>, vector<2x2xf32>, vector<2x2xf32>, vector<2x2xf32> -> vector<8x2xf32>
    %247 = arith.mulf %246, %118 : vector<8x2xf32>
    %248 = arith.addf %112, %247 : vector<8x2xf32>
    %249 = math.tanh %248 : vector<8x2xf32>
    %cst_43 = arith.constant 5.000000e-01 : f32
    %250 = vector.broadcast %cst_43 : f32 to vector<8x2xf32>
    %251 = arith.mulf %249, %250 : vector<8x2xf32>
    %cst_44 = arith.constant 5.000000e-01 : f32
    %252 = vector.broadcast %cst_44 : f32 to vector<8x2xf32>
    %253 = arith.addf %251, %252 : vector<8x2xf32>
    %254 = vector.extract_strided_slice %253 {offsets = [2, 0], sizes = [2, 2], strides = [1, 1]} : vector<8x2xf32> to vector<2x2xf32>
    %255 = arith.mulf %254, %238 : vector<2x2xf32>
    %256 = vector.extract_strided_slice %253 {offsets = [0, 0], sizes = [2, 2], strides = [1, 1]} : vector<8x2xf32> to vector<2x2xf32>
    %257 = vector.extract_strided_slice %249 {offsets = [4, 0], sizes = [2, 2], strides = [1, 1]} : vector<8x2xf32> to vector<2x2xf32>
    %258 = arith.mulf %256, %257 : vector<2x2xf32>
    %259 = arith.addf %255, %258 : vector<2x2xf32>
    %260 = vector.extract_strided_slice %253 {offsets = [6, 0], sizes = [2, 2], strides = [1, 1]} : vector<8x2xf32> to vector<2x2xf32>
    %261 = math.tanh %259 : vector<2x2xf32>
    %262 = arith.mulf %260, %261 : vector<2x2xf32>
    %263 = vector.extract_strided_slice %262 {offsets = [0, 0], sizes = [1, 2], strides = [1, 1]} : vector<2x2xf32> to vector<1x2xf32>
    %c6 = arith.constant 6 : index
    %c0_45 = arith.constant 0 : index
    %264 = vector.load %arg8[%c6, %c0_45] : memref<16x2xf32, #tpu.memory_space<vmem>>, vector<1x2xf32>
    tpu.vector_store %arg8[%c6, %c0_45], %263 {strides = array<i32>} : memref<16x2xf32, #tpu.memory_space<vmem>>, vector<1x2xf32>,
    %265 = vector.extract_strided_slice %262 {offsets = [1, 0], sizes = [1, 2], strides = [1, 1]} : vector<2x2xf32> to vector<1x2xf32>
    %c9 = arith.constant 9 : index
    %c0_46 = arith.constant 0 : index
    %266 = vector.load %arg8[%c9, %c0_46] : memref<16x2xf32, #tpu.memory_space<vmem>>, vector<1x2xf32>
    tpu.vector_store %arg8[%c9, %c0_46], %265 {strides = array<i32>} : memref<16x2xf32, #tpu.memory_space<vmem>>, vector<1x2xf32>,
    %267 = tpu.concatenate %262, %262, %262, %262 in 0 : vector<2x2xf32>, vector<2x2xf32>, vector<2x2xf32>, vector<2x2xf32> -> vector<8x2xf32>
    %268 = arith.mulf %267, %118 : vector<8x2xf32>
    %269 = arith.addf %115, %268 : vector<8x2xf32>
    %270 = math.tanh %269 : vector<8x2xf32>
    %cst_47 = arith.constant 5.000000e-01 : f32
    %271 = vector.broadcast %cst_47 : f32 to vector<8x2xf32>
    %272 = arith.mulf %270, %271 : vector<8x2xf32>
    %cst_48 = arith.constant 5.000000e-01 : f32
    %273 = vector.broadcast %cst_48 : f32 to vector<8x2xf32>
    %274 = arith.addf %272, %273 : vector<8x2xf32>
    %275 = vector.extract_strided_slice %274 {offsets = [2, 0], sizes = [2, 2], strides = [1, 1]} : vector<8x2xf32> to vector<2x2xf32>
    %276 = arith.mulf %275, %259 : vector<2x2xf32>
    %277 = vector.extract_strided_slice %274 {offsets = [0, 0], sizes = [2, 2], strides = [1, 1]} : vector<8x2xf32> to vector<2x2xf32>
    %278 = vector.extract_strided_slice %270 {offsets = [4, 0], sizes = [2, 2], strides = [1, 1]} : vector<8x2xf32> to vector<2x2xf32>
    %279 = arith.mulf %277, %278 : vector<2x2xf32>
    %280 = arith.addf %276, %279 : vector<2x2xf32>
    %281 = vector.extract_strided_slice %274 {offsets = [6, 0], sizes = [2, 2], strides = [1, 1]} : vector<8x2xf32> to vector<2x2xf32>
    %282 = math.tanh %280 : vector<2x2xf32>
    %283 = arith.mulf %281, %282 : vector<2x2xf32>
    %284 = vector.extract_strided_slice %283 {offsets = [0, 0], sizes = [1, 2], strides = [1, 1]} : vector<2x2xf32> to vector<1x2xf32>
    %c7 = arith.constant 7 : index
    %c0_49 = arith.constant 0 : index
    %285 = vector.load %arg8[%c7, %c0_49] : memref<16x2xf32, #tpu.memory_space<vmem>>, vector<1x2xf32>
    tpu.vector_store %arg8[%c7, %c0_49], %284 {strides = array<i32>} : memref<16x2xf32, #tpu.memory_space<vmem>>, vector<1x2xf32>,
    %286 = vector.extract_strided_slice %283 {offsets = [1, 0], sizes = [1, 2], strides = [1, 1]} : vector<2x2xf32> to vector<1x2xf32>
    %c8 = arith.constant 8 : index
    %c0_50 = arith.constant 0 : index
    %287 = vector.load %arg8[%c8, %c0_50] : memref<16x2xf32, #tpu.memory_space<vmem>>, vector<1x2xf32>
    tpu.vector_store %arg8[%c8, %c0_50], %286 {strides = array<i32>} : memref<16x2xf32, #tpu.memory_space<vmem>>, vector<1x2xf32>,
    %c0_51 = arith.constant 0 : index
    %c0_52 = arith.constant 0 : index
    %288 = vector.load %arg8[%c0_51, %c0_52] : memref<16x2xf32, #tpu.memory_space<vmem>>, vector<16x2xf32>
    %289 = vector.extract_strided_slice %288 {offsets = [0, 0], sizes = [8, 2], strides = [1, 1]} : vector<16x2xf32> to vector<8x2xf32>
    %290 = vector.extract_strided_slice %288 {offsets = [8, 0], sizes = [8, 2], strides = [1, 1]} : vector<16x2xf32> to vector<8x2xf32>
    %291 = arith.addf %289, %290 : vector<8x2xf32>
    %292 = tpu.transpose %291, [1, 0] : vector<8x2xf32> -> vector<2x8xf32>
    %293 = vector.broadcast %3 : f32 to vector<2x8xf32>
    %294 = arith.addf %292, %293 : vector<2x8xf32>
    %c0_53 = arith.constant 0 : index
    %c0_54 = arith.constant 0 : index
    %295 = vector.load %arg5[%c0_53, %c0_54] : memref<2x8xi32, #tpu.memory_space<vmem>>, vector<2x8xi32>
    %c0_i32_55 = arith.constant 0 : i32
    %296 = vector.broadcast %c0_i32_55 : i32 to vector<2x8xi32>
    %297 = arith.cmpi ne, %295, %296 : vector<2x8xi32>
    %cst_56 = arith.constant 0xFF800000 : f32
    %298 = vector.broadcast %cst_56 : f32 to vector<2x8xf32>
    %299 = arith.select %297, %294, %298 : vector<2x8xi1>, vector<2x8xf32>
    %cst_57 = arith.constant dense<0xFF800000> : vector<2xf32>
    %300 = vector.multi_reduction <maximumf>, %299, %cst_57 [1] : vector<2x8xf32> to vector<2xf32>
    %301 = vector.shape_cast %300 : vector<2xf32> to vector<2x1xf32>
    %302 = vector.broadcast %301 : vector<2x1xf32> to vector<2x8xf32>
    %303 = arith.subf %299, %302 : vector<2x8xf32>
    %304 = math.exp %303 : vector<2x8xf32>
    %cst_58 = arith.constant dense<0.000000e+00> : vector<2xf32>
    %305 = vector.multi_reduction <add>, %304, %cst_58 [1] : vector<2x8xf32> to vector<2xf32>
    %306 = vector.shape_cast %305 : vector<2xf32> to vector<2x1xf32>
    %307 = tpu.reciprocal %306 {approx = true} : vector<2x1xf32> -> vector<2x1xf32>
    %308 = vector.broadcast %307 : vector<2x1xf32> to vector<2x8xf32>
    %309 = arith.mulf %304, %308 : vector<2x8xf32>
    %c0_59 = arith.constant 0 : index
    %c0_60 = arith.constant 0 : index
    %310 = vector.load %arg7[%c0_59, %c0_60] : memref<2x8xf32, #tpu.memory_space<vmem>>, vector<2x8xf32>
    tpu.vector_store %arg7[%c0_59, %c0_60], %309 {strides = array<i32>} : memref<2x8xf32, #tpu.memory_space<vmem>>, vector<2x8xf32>,
    %c0_61 = arith.constant 0 : index
    %c0_62 = arith.constant 0 : index
    %c0_63 = arith.constant 0 : index
    %311 = vector.load %arg1[%c0_61, %c0_62, %c0_63] : memref<2x8x32xf32, #tpu.memory_space<vmem>>, vector<2x1x32xf32>
    %312 = vector.shape_cast %311 : vector<2x1x32xf32> to vector<2x32xf32>
    %313 = vector.extract_strided_slice %309 {offsets = [0, 0], sizes = [2, 1], strides = [1, 1]} : vector<2x8xf32> to vector<2x1xf32>
    %314 = vector.broadcast %313 : vector<2x1xf32> to vector<2x32xf32>
    %315 = arith.mulf %312, %314 : vector<2x32xf32>
    %c0_64 = arith.constant 0 : index
    %c1_65 = arith.constant 1 : index
    %c0_66 = arith.constant 0 : index
    %316 = vector.load %arg1[%c0_64, %c1_65, %c0_66] : memref<2x8x32xf32, #tpu.memory_space<vmem>>, vector<2x1x32xf32>
    %317 = vector.shape_cast %316 : vector<2x1x32xf32> to vector<2x32xf32>
    %318 = vector.extract_strided_slice %309 {offsets = [0, 1], sizes = [2, 1], strides = [1, 1]} : vector<2x8xf32> to vector<2x1xf32>
    %319 = vector.broadcast %318 : vector<2x1xf32> to vector<2x32xf32>
    %320 = arith.mulf %317, %319 : vector<2x32xf32>
    %321 = arith.maximumf %315, %320 : vector<2x32xf32>
    %c0_67 = arith.constant 0 : index
    %c2_68 = arith.constant 2 : index
    %c0_69 = arith.constant 0 : index
    %322 = vector.load %arg1[%c0_67, %c2_68, %c0_69] : memref<2x8x32xf32, #tpu.memory_space<vmem>>, vector<2x1x32xf32>
    %323 = vector.shape_cast %322 : vector<2x1x32xf32> to vector<2x32xf32>
    %324 = vector.extract_strided_slice %309 {offsets = [0, 2], sizes = [2, 1], strides = [1, 1]} : vector<2x8xf32> to vector<2x1xf32>
    %325 = vector.broadcast %324 : vector<2x1xf32> to vector<2x32xf32>
    %326 = arith.mulf %323, %325 : vector<2x32xf32>
    %327 = arith.maximumf %321, %326 : vector<2x32xf32>
    %c0_70 = arith.constant 0 : index
    %c3_71 = arith.constant 3 : index
    %c0_72 = arith.constant 0 : index
    %328 = vector.load %arg1[%c0_70, %c3_71, %c0_72] : memref<2x8x32xf32, #tpu.memory_space<vmem>>, vector<2x1x32xf32>
    %329 = vector.shape_cast %328 : vector<2x1x32xf32> to vector<2x32xf32>
    %330 = vector.extract_strided_slice %309 {offsets = [0, 3], sizes = [2, 1], strides = [1, 1]} : vector<2x8xf32> to vector<2x1xf32>
    %331 = vector.broadcast %330 : vector<2x1xf32> to vector<2x32xf32>
    %332 = arith.mulf %329, %331 : vector<2x32xf32>
    %333 = arith.maximumf %327, %332 : vector<2x32xf32>
    %c0_73 = arith.constant 0 : index
    %c4_74 = arith.constant 4 : index
    %c0_75 = arith.constant 0 : index
    %334 = vector.load %arg1[%c0_73, %c4_74, %c0_75] : memref<2x8x32xf32, #tpu.memory_space<vmem>>, vector<2x1x32xf32>
    %335 = vector.shape_cast %334 : vector<2x1x32xf32> to vector<2x32xf32>
    %336 = vector.extract_strided_slice %309 {offsets = [0, 4], sizes = [2, 1], strides = [1, 1]} : vector<2x8xf32> to vector<2x1xf32>
    %337 = vector.broadcast %336 : vector<2x1xf32> to vector<2x32xf32>
    %338 = arith.mulf %335, %337 : vector<2x32xf32>
    %339 = arith.maximumf %333, %338 : vector<2x32xf32>
    %c0_76 = arith.constant 0 : index
    %c5_77 = arith.constant 5 : index
    %c0_78 = arith.constant 0 : index
    %340 = vector.load %arg1[%c0_76, %c5_77, %c0_78] : memref<2x8x32xf32, #tpu.memory_space<vmem>>, vector<2x1x32xf32>
    %341 = vector.shape_cast %340 : vector<2x1x32xf32> to vector<2x32xf32>
    %342 = vector.extract_strided_slice %309 {offsets = [0, 5], sizes = [2, 1], strides = [1, 1]} : vector<2x8xf32> to vector<2x1xf32>
    %343 = vector.broadcast %342 : vector<2x1xf32> to vector<2x32xf32>
    %344 = arith.mulf %341, %343 : vector<2x32xf32>
    %345 = arith.maximumf %339, %344 : vector<2x32xf32>
    %c0_79 = arith.constant 0 : index
    %c6_80 = arith.constant 6 : index
    %c0_81 = arith.constant 0 : index
    %346 = vector.load %arg1[%c0_79, %c6_80, %c0_81] : memref<2x8x32xf32, #tpu.memory_space<vmem>>, vector<2x1x32xf32>
    %347 = vector.shape_cast %346 : vector<2x1x32xf32> to vector<2x32xf32>
    %348 = vector.extract_strided_slice %309 {offsets = [0, 6], sizes = [2, 1], strides = [1, 1]} : vector<2x8xf32> to vector<2x1xf32>
    %349 = vector.broadcast %348 : vector<2x1xf32> to vector<2x32xf32>
    %350 = arith.mulf %347, %349 : vector<2x32xf32>
    %351 = arith.maximumf %345, %350 : vector<2x32xf32>
    %c0_82 = arith.constant 0 : index
    %c7_83 = arith.constant 7 : index
    %c0_84 = arith.constant 0 : index
    %352 = vector.load %arg1[%c0_82, %c7_83, %c0_84] : memref<2x8x32xf32, #tpu.memory_space<vmem>>, vector<2x1x32xf32>
    %353 = vector.shape_cast %352 : vector<2x1x32xf32> to vector<2x32xf32>
    %354 = vector.extract_strided_slice %309 {offsets = [0, 7], sizes = [2, 1], strides = [1, 1]} : vector<2x8xf32> to vector<2x1xf32>
    %355 = vector.broadcast %354 : vector<2x1xf32> to vector<2x32xf32>
    %356 = arith.mulf %353, %355 : vector<2x32xf32>
    %357 = arith.maximumf %351, %356 : vector<2x32xf32>
    %c0_85 = arith.constant 0 : index
    %c0_86 = arith.constant 0 : index
    %358 = vector.load %arg6[%c0_85, %c0_86] : memref<2x32xf32, #tpu.memory_space<vmem>>, vector<2x32xf32>
    tpu.vector_store %arg6[%c0_85, %c0_86], %357 {strides = array<i32>} : memref<2x32xf32, #tpu.memory_space<vmem>>, vector<2x32xf32>,
    return
  }
  func.func @transform_0(%arg0: i32) -> (i32, i32, i32) {
    %c0_i32 = arith.constant 0 : i32
    %c0_i32_0 = arith.constant 0 : i32
    %c0_i32_1 = arith.constant 0 : i32
    return %arg0, %c0_i32, %c0_i32_0 : i32, i32, i32
  }
  func.func @transform_1(%arg0: i32) -> (i32, i32) {
    %c0_i32 = arith.constant 0 : i32
    %c0_i32_0 = arith.constant 0 : i32
    %c0_i32_1 = arith.constant 0 : i32
    return %c0_i32, %c0_i32_0 : i32, i32
  }
  func.func @transform_2(%arg0: i32) -> (i32, i32) {
    %c0_i32 = arith.constant 0 : i32
    %c0_i32_0 = arith.constant 0 : i32
    %c0_i32_1 = arith.constant 0 : i32
    return %c0_i32, %c0_i32_0 : i32, i32
  }
  func.func @transform_3(%arg0: i32) -> (i32, i32) {
    %c0_i32 = arith.constant 0 : i32
    %c0_i32_0 = arith.constant 0 : i32
    %c0_i32_1 = arith.constant 0 : i32
    return %c0_i32, %c0_i32_0 : i32, i32
  }
  func.func @transform_4(%arg0: i32) -> (i32, i32) {
    %c0_i32 = arith.constant 0 : i32
    %c0_i32_0 = arith.constant 0 : i32
    return %arg0, %c0_i32 : i32, i32
  }
  func.func @transform_5(%arg0: i32) -> (i32, i32) {
    %c0_i32 = arith.constant 0 : i32
    %c0_i32_0 = arith.constant 0 : i32
    return %arg0, %c0_i32 : i32, i32
  }
  func.func @transform_6(%arg0: i32) -> (i32, i32) {
    %c0_i32 = arith.constant 0 : i32
    %c0_i32_0 = arith.constant 0 : i32
    return %arg0, %c0_i32 : i32, i32
  }
}

</mosaic_0001>

<bundles_post_ra>
// kernel: attention_birnn.1
= control target key start
LH: loop header
LB: loop body
LE: loop exit
PB: predicated region body
PF: predicated region fallthrough
CT: control target
= control target key end

     0   :  { %13 = vsyncpa [#allocation5], 0  ;;  %v92_v1 = vlaneseq  ;;  %v987_v2 = vmov 0.0   ;;  %vm988_vm0 = vmmov 0   ;;  %v989_v8 = vmov 1   ;;  %s1271_s0 = inlined_call_operand.vmem [shape: f32[2,8,32], index: 0, kind: input, shape index: {}]   ;;  %s1272_s1 = inlined_call_operand.vmem [shape: bf16[32,8], index: 1, kind: input, shape index: {}]   ;;  %s1273_s2 = inlined_call_operand.vmem [shape: f32[8,2], index: 2, kind: input, shape index: {}]   ;;  %s1274_s3 = inlined_call_operand.<no memory space> [shape: f32[1,1], index: 3, kind: input, shape index: {}]   ;;  %s1275_s4 = inlined_call_operand.vmem [shape: s32[2,8], index: 4, kind: input, shape index: {}]   ;;  %s1276_s5 = inlined_call_operand.hbm [shape: f32[2,32], index: 5, kind: output, shape index: {0}]   ;;  %s1277_s6 = inlined_call_operand.hbm [shape: f32[2,8], index: 6, kind: output, shape index: {1}]  }
   0x1   :  { %v901_v0 = vld [vmem:[%s1272_s1] sm:$0xff]   ;;  %869 = vmatprep.subr.bf16.mxu0 %v987_v2  ;;  %v902_v3 = vld [vmem:[%s1272_s1 + $0x8] sm:$0xff]   ;;  %873 = vmatprep.mubr.msk.bf16.mxu0 %vm988_vm0, %v987_v2 }
   0x2   :  { %870 = vmatpush3.bf16.msra.mxu0 %v901_v0  ;;  %v32_v4 = vld [vmem:[%s1271_s0] sm:$0xff]  ;;  %v33_v5 = vld [vmem:[%s1271_s0 + $0x8] sm:$0xff]  ;;  %v1050_v7 = vshrl.u32 %v92_v1, 7  ;;  %890 = vset.pattern.permute.xlu0 %v989_v8 }
   0x3   :  { %v30_v6 = vld [vmem:[%s1273_s2] sm:$0xff]  ;;  %871 = vmatprep.subr.bf16.mxu0 %v987_v2 }
   0x4   :  { %14 = vsyncpa [#allocation7], 0  ;;  %vm107_vm1 = vcmp.eq.s32.totalorder %v1050_v7, 4  ;;  %vm108_vm2 = vcmp.eq.s32.totalorder %v1050_v7, 5  ;;  %151 = vperm.xlu0 %890, %v30_v6   ;;  %v34_v9 = vpack.c.bf16 %v33_v5, %v32_v4  ;;  %vm47_vm4 = vcmask 261120  }
   0x5   :  { %vm109_vm3 = vmor %vm107_vm1, %vm108_vm2  ;;  %v990_v10 = vmov 0.5   ;;  %v991_v13 = vmov 0   ;;  %vm114_vm5 = vcmask 1041409   ;;  %v98_v43 = vand.u32 1, %v1050_v7 }
   0x6   :  { %872 = vmatpush3.bf16.msra.mxu0 %v902_v3  ;;  %v1054_v11 = vsel %vm109_vm3, 1.0, %v990_v10  ;;  %vm456_vm7 = vcmask 14342   ;;  %vm458_vm8 = vcmask 15367   ;;  %vm467_vm9 = vcmask 1041408  }
   0x7   :  { %v431_v12 = vmul.f32 %v1054_v11, %v30_v6  ;;  %vm1073_vm6 = vcmp.eq.s32.totalorder %v98_v43, 1  ;;  %vm469_vm10 = vcmask 1043456   ;;  %vm471_vm11 = vcmask 1045504  }
   0x8   :  { %891 = vset.pattern.permute.xlu0 %v991_v13  ;;  %vm720_vm13 = vcmask 58368  }
   0x9   :  { %874 = vmatmul.mubr.msk.bf16.vlgmr.msra.gmra.mrb[0].mxu0 %vm47_vm4, %v34_v9  ;;  %434 = vperm.xlu0 %891, %v431_v12  }
  0x83   :  { %v1066_v40 = vpop.permute.xlu0 %151 }
  0x88   :  { %v1068_v41 = vpop.permute.xlu0 %434 }
  0x89   :  { %v437_v49 = vmul.f32 0.0, %v1068_v41 }
  0xdc   :  { %v85_v14 = vpop.f32.mrb[0].mxu0 }
  0xdd   :  { %v875_v15 = vpop.f32.mrb[1].mxu0  ;;  %v345_v16 = vrot.slane %v85_v14, 6  ;;  %v156_v17 = vrot.slane %v85_v14, 1  ;;  %v383_v19 = vrot.slane %v85_v14, 7  ;;  %v193_v20 = vrot.slane %v85_v14, 2 }
  0xde   :  { %v88_v18 = vpop.f32.mrb[2].mxu0  ;;  %v307_v21 = vrot.slane %v85_v14, 5  ;;  %v231_v22 = vrot.slane %v85_v14, 3  ;;  %v269_v35 = vrot.slane %v85_v14, 4 }
  0xdf   :  { %v876_v23 = vpop.f32.mrb[3].mxu0  ;;  %v346_v24 = vrot.slane %v88_v18, 5  ;;  %v113_v25 = vrot.slane %v88_v18, 7  ;;  %v384_v26 = vrot.slane %v88_v18, 6  ;;  %v157_v27 = vsel %vm114_vm5, %v88_v18, %v156_v17 }
  0xe0   :  { %v194_v28 = vrot.slane %v88_v18, 1  ;;  %v308_v29 = vrot.slane %v88_v18, 4  ;;  %v232_v30 = vrot.slane %v88_v18, 2  ;;  %v270_v31 = vrot.slane %v88_v18, 3 }
  0xe1   :  { %v347_v32 = vsel %vm114_vm5, %v346_v24, %v345_v16  ;;  %v115_v33 = vsel %vm114_vm5, %v113_v25, %v85_v14  ;;  %v385_v34 = vsel %vm114_vm5, %v384_v26, %v383_v19 }
  0xe2   :  { %349 = vxpose.xlu0.b32.start.end [1/1] (short) (narrow) %v347_v32, 8  ;;  %117 = vxpose.xlu1.b32.start.end [1/1] (short) (narrow) %v115_v33, 8  ;;  %v195_v36 = vsel %vm114_vm5, %v194_v28, %v193_v20  ;;  %v309_v37 = vsel %vm114_vm5, %v308_v29, %v307_v21  ;;  %v233_v38 = vsel %vm114_vm5, %v232_v30, %v231_v22 }
  0xe3   :  { %v271_v39 = vsel %vm114_vm5, %v270_v31, %v269_v35 }
  0xe6   :  { %387 = vxpose.xlu1.b32.start.end [1/1] (short) (narrow) %v385_v34, 8 }
  0xea   :  { %159 = vxpose.xlu1.b32.start.end [1/1] (short) (narrow) %v157_v27, 8 }
  0xee   :  { %197 = vxpose.xlu1.b32.start.end [1/1] (short) (narrow) %v195_v36, 8 }
  0xf2   :  { %311 = vxpose.xlu1.b32.start.end [1/1] (short) (narrow) %v309_v37, 8 }
  0xf6   :  { %235 = vxpose.xlu1.b32.start.end [1/1] (short) (narrow) %v233_v38, 8 }
  0xfa   :  { %273 = vxpose.xlu1.b32.start.end [1/1] (short) (narrow) %v271_v39, 8 }
 0x10b   :  { %893 = vset.pattern.permute.xlu0 %v989_v8 }
 0x162   :  { %v133_v42 = vpop.trf.xlu1  ;;  %v365_v45 = vpop.trf.xlu0 }
 0x163   :  { %v154_v44 = vadd.f32 %v1066_v40, %v133_v42  ;;  %v381_v51 = vadd.f32 %v365_v45, %v1066_v40 }
 0x165   :  { %v1079_v50 = vmul.f32 %v154_v44, %v1054_v11  ;;  %v1095_v58 = vmul.f32 %v381_v51, %v1054_v11 }
 0x166   :  { %v403_v46 = vpop.trf.xlu1 }
 0x167   :  { %v419_v47 = vadd.f32 %v403_v46, %v1066_v40 }
 0x169   :  { %v1083_v52 = vmul.f32 %v419_v47, %v1054_v11 }
 0x16a   :  { %v175_v53 = vpop.trf.xlu1 }
 0x16b   :  { %v423_v54 = vsel %vm1073_vm6, %v1083_v52, %v1079_v50  ;;  %v430_v55 = vsel %vm1073_vm6, %v1079_v50, %v1083_v52  ;;  %v191_v56 = vadd.f32 %v175_v53, %v1066_v40  ;;  %v717_v52 = vld [vmem:[%s1275_s4] sm:$0x3] }
 0x16c   :  { %v438_v57 = vadd.f32 %v437_v49, %v423_v54  ;;  %vm718_vm12 = vcmp.ne.s32.totalorder %v717_v52, 0 }
 0x16d   :  { %v1098_v59 = vmul.f32 %v191_v56, %v1054_v11 }
 0x16e   :  { %903 = vtanh.f32 %v438_v57  ;;  %v213_v60 = vpop.trf.xlu1 }
 0x16f   :  { %v429_v61 = vsel %vm1073_vm6, %v1098_v59, %v1095_v58  ;;  %v229_v62 = vadd.f32 %v213_v60, %v1066_v40  ;;  %v424_v24 = vsel %vm1073_vm6, %v1095_v58, %v1098_v59 }
 0x171   :  { %v1107_v1 = vmul.f32 %v229_v62, %v1054_v11 }
 0x172   :  { %v327_v63 = vpop.trf.xlu1 }
 0x173   :  { %v343_v0 = vadd.f32 %v327_v63, %v1066_v40 }
 0x175   :  { %v1110_v2 = vmul.f32 %v343_v0, %v1054_v11 }
 0x176   :  { %v251_v63 = vpop.trf.xlu1 }
 0x177   :  { %v428_v3 = vsel %vm1073_vm6, %v1107_v1, %v1110_v2  ;;  %v425_v46 = vsel %vm1073_vm6, %v1110_v2, %v1107_v1 }
 0x178   :  { %v904_v4 = vpop.eup %903 }
 0x179   :  { %v440_v5 = vmul.f32 0.5, %v904_v4  ;;  %v444_v7 = vrot.slane %v904_v4, 4 }
 0x17a   :  { %v289_v4 = vpop.trf.xlu1 }
 0x17b   :  { %v441_v6 = vadd.f32 0.5, %v440_v5 }
 0x17d   :  { %v446_v8 = vmul.f32 %v444_v7, %v441_v6  ;;  %v442_v9 = vmul.f32 0.0, %v441_v6  ;;  %v305_v7 = vadd.f32 %v289_v4, %v1066_v40 }
 0x17f   :  { %v448_v10 = vrot.slane %v446_v8, 6  ;;  %v267_v8 = vadd.f32 %v251_v63, %v1066_v40 }
 0x181   :  { %v450_v12 = vadd.f32 %v448_v10, %v442_v9 }
 0x183   :  { %905 = vtanh.f32 %v450_v12 }
 0x18d   :  { %v906_v14 = vpop.eup %905 }
 0x18e   :  { %v453_v15 = vrot.slane %v906_v14, 4 }
 0x190   :  { %v455_v16 = vmul.f32 %v453_v15, %v441_v6  ;;  %v306_v15 = vmul.f32 %v305_v7, %v1054_v11 }
 0x192   :  { %v461_v17 = vrot.slane %v455_v16, 6  ;;  %v463_v18 = vrot.slane %v455_v16, 4  ;;  %v465_v19 = vrot.slane %v455_v16, 2  ;;  %457 = vst.msk [vmem:[#allocation2 - $0x6] sm:$0x40] %vm456_vm7, %v455_v16 }
 0x193   :  { %459 = vst.msk [vmem:[#allocation2 + $0x8] sm:$0x80] %vm458_vm8, %v455_v16 }
 0x194   :  { %v468_v20 = vsel %vm467_vm9, %v461_v17, %v463_v18  ;;  %v268_v17 = vmul.f32 %v267_v8, %v1054_v11 }
 0x195   :  { %v470_v21 = vsel %vm469_vm10, %v468_v20, %v465_v19 }
 0x196   :  { %v472_v22 = vsel %vm471_vm11, %v470_v21, %v455_v16  ;;  %v426_v40 = vsel %vm1073_vm6, %v306_v15, %v268_v17 }
 0x197   :  { %v473_v23 = vmul.f32 %v472_v22, %v1068_v41 }
 0x199   :  { %v474_v25 = vadd.f32 %v473_v23, %v424_v24 }
 0x19b   :  { %907 = vtanh.f32 %v474_v25 }
 0x1a5   :  { %v908_v26 = vpop.eup %907 }
 0x1a6   :  { %v476_v27 = vmul.f32 0.5, %v908_v26  ;;  %v480_v29 = vrot.slane %v908_v26, 4 }
 0x1a8   :  { %v477_v28 = vadd.f32 0.5, %v476_v27 }
 0x1aa   :  { %v482_v30 = vmul.f32 %v480_v29, %v477_v28  ;;  %v478_v31 = vmul.f32 %v477_v28, %v450_v12 }
 0x1ac   :  { %v484_v32 = vrot.slane %v482_v30, 6 }
 0x1ae   :  { %v486_v33 = vadd.f32 %v484_v32, %v478_v31 }
 0x1b0   :  { %909 = vtanh.f32 %v486_v33 }
 0x1ba   :  { %v910_v34 = vpop.eup %909 }
 0x1bb   :  { %v489_v35 = vrot.slane %v910_v34, 4 }
 0x1bd   :  { %v491_v36 = vmul.f32 %v489_v35, %v477_v28 }
 0x1bf   :  { %v495_v37 = vrot.slane %v491_v36, 6  ;;  %v497_v38 = vrot.slane %v491_v36, 4  ;;  %v499_v39 = vrot.slane %v491_v36, 2  ;;  %492 = vst.msk [vmem:[#allocation2 - $0x5] sm:$0x40] %vm456_vm7, %v491_v36 }
 0x1c0   :  { %493 = vst.msk [vmem:[#allocation2 + $0x7] sm:$0x80] %vm458_vm8, %v491_v36 }
 0x1c1   :  { %v501_v42 = vsel %vm467_vm9, %v495_v37, %v497_v38  ;;  %v427_v38 = vsel %vm1073_vm6, %v268_v17, %v306_v15 }
 0x1c2   :  { %v502_v43 = vsel %vm469_vm10, %v501_v42, %v499_v39 }
 0x1c3   :  { %v503_v44 = vsel %vm471_vm11, %v502_v43, %v491_v36 }
 0x1c4   :  { %v504_v45 = vmul.f32 %v503_v44, %v1068_v41 }
 0x1c6   :  { %v505_v47 = vadd.f32 %v504_v45, %v425_v46 }
 0x1c8   :  { %911 = vtanh.f32 %v505_v47 }
 0x1d2   :  { %v912_v49 = vpop.eup %911 }
 0x1d3   :  { %v507_v51 = vmul.f32 0.5, %v912_v49  ;;  %v511_v54 = vrot.slane %v912_v49, 4 }
 0x1d5   :  { %v508_v53 = vadd.f32 0.5, %v507_v51 }
 0x1d7   :  { %v513_v56 = vmul.f32 %v511_v54, %v508_v53  ;;  %v509_v57 = vmul.f32 %v508_v53, %v486_v33 }
 0x1d9   :  { %v515_v60 = vrot.slane %v513_v56, 6 }
 0x1db   :  { %v517_v62 = vadd.f32 %v515_v60, %v509_v57 }
 0x1dd   :  { %913 = vtanh.f32 %v517_v62 }
 0x1e7   :  { %v914_v0 = vpop.eup %913 }
 0x1e8   :  { %v520_v5 = vrot.slane %v914_v0, 4 }
 0x1ea   :  { %v522_v6 = vmul.f32 %v520_v5, %v508_v53 }
 0x1ec   :  { %v526_v9 = vrot.slane %v522_v6, 6  ;;  %v528_v10 = vrot.slane %v522_v6, 4  ;;  %v530_v12 = vrot.slane %v522_v6, 2  ;;  %523 = vst.msk [vmem:[#allocation2 - $0x4] sm:$0x40] %vm456_vm7, %v522_v6 }
 0x1ed   :  { %524 = vst.msk [vmem:[#allocation2 + $0x6] sm:$0x80] %vm458_vm8, %v522_v6 }
 0x1ee   :  { %v532_v14 = vsel %vm467_vm9, %v526_v9, %v528_v10 }
 0x1ef   :  { %v533_v16 = vsel %vm469_vm10, %v532_v14, %v530_v12 }
 0x1f0   :  { %v534_v18 = vsel %vm471_vm11, %v533_v16, %v522_v6 }
 0x1f1   :  { %v535_v19 = vmul.f32 %v534_v18, %v1068_v41 }
 0x1f3   :  { %v536_v20 = vadd.f32 %v535_v19, %v426_v40 }
 0x1f5   :  { %915 = vtanh.f32 %v536_v20 }
 0x1ff   :  { %v916_v21 = vpop.eup %915 }
 0x200   :  { %v538_v22 = vmul.f32 0.5, %v916_v21  ;;  %v542_v24 = vrot.slane %v916_v21, 4 }
 0x202   :  { %v539_v23 = vadd.f32 0.5, %v538_v22 }
 0x204   :  { %v544_v25 = vmul.f32 %v542_v24, %v539_v23  ;;  %v540_v26 = vmul.f32 %v539_v23, %v517_v62 }
 0x206   :  { %v546_v27 = vrot.slane %v544_v25, 6 }
 0x208   :  { %v548_v28 = vadd.f32 %v546_v27, %v540_v26 }
 0x20a   :  { %917 = vtanh.f32 %v548_v28 }
 0x214   :  { %v918_v29 = vpop.eup %917 }
 0x215   :  { %v551_v11 = vrot.slane %v918_v29, 4 }
 0x217   :  { %v553_v30 = vmul.f32 %v551_v11, %v539_v23 }
 0x219   :  { %v557_v31 = vrot.slane %v553_v30, 6  ;;  %v559_v32 = vrot.slane %v553_v30, 4  ;;  %v561_v33 = vrot.slane %v553_v30, 2  ;;  %554 = vst.msk [vmem:[#allocation2 - $0x3] sm:$0x40] %vm456_vm7, %v553_v30 }
 0x21a   :  { %555 = vst.msk [vmem:[#allocation2 + $0x5] sm:$0x80] %vm458_vm8, %v553_v30 }
 0x21b   :  { %v563_v34 = vsel %vm467_vm9, %v557_v31, %v559_v32 }
 0x21c   :  { %v564_v35 = vsel %vm469_vm10, %v563_v34, %v561_v33 }
 0x21d   :  { %v565_v36 = vsel %vm471_vm11, %v564_v35, %v553_v30 }
 0x21e   :  { %v566_v37 = vmul.f32 %v565_v36, %v1068_v41 }
 0x220   :  { %v567_v39 = vadd.f32 %v566_v37, %v427_v38 }
 0x222   :  { %919 = vtanh.f32 %v567_v39 }
 0x22c   :  { %v920_v42 = vpop.eup %919 }
 0x22d   :  { %v569_v43 = vmul.f32 0.5, %v920_v42  ;;  %v573_v45 = vrot.slane %v920_v42, 4 }
 0x22f   :  { %v570_v44 = vadd.f32 0.5, %v569_v43 }
 0x231   :  { %v575_v46 = vmul.f32 %v573_v45, %v570_v44  ;;  %v571_v47 = vmul.f32 %v570_v44, %v548_v28 }
 0x233   :  { %v577_v49 = vrot.slane %v575_v46, 6 }
 0x235   :  { %v579_v51 = vadd.f32 %v577_v49, %v571_v47 }
 0x237   :  { %921 = vtanh.f32 %v579_v51 }
 0x241   :  { %v922_v53 = vpop.eup %921 }
 0x242   :  { %v582_v54 = vrot.slane %v922_v53, 4 }
 0x244   :  { %v584_v56 = vmul.f32 %v582_v54, %v570_v44 }
 0x246   :  { %v588_v57 = vrot.slane %v584_v56, 6  ;;  %v590_v60 = vrot.slane %v584_v56, 4  ;;  %v592_v62 = vrot.slane %v584_v56, 2  ;;  %585 = vst.msk [vmem:[#allocation2 - $0x2] sm:$0x40] %vm456_vm7, %v584_v56 }
 0x247   :  { %586 = vst.msk [vmem:[#allocation2 + $0x4] sm:$0x80] %vm458_vm8, %v584_v56 }
 0x248   :  { %v594_v63 = vsel %vm467_vm9, %v588_v57, %v590_v60 }
 0x249   :  { %v595_v0 = vsel %vm469_vm10, %v594_v63, %v592_v62 }
 0x24a   :  { %v596_v4 = vsel %vm471_vm11, %v595_v0, %v584_v56 }
 0x24b   :  { %v597_v5 = vmul.f32 %v596_v4, %v1068_v41 }
 0x24d   :  { %v598_v6 = vadd.f32 %v597_v5, %v428_v3 }
 0x24f   :  { %923 = vtanh.f32 %v598_v6 }
 0x259   :  { %v924_v7 = vpop.eup %923 }
 0x25a   :  { %v600_v8 = vmul.f32 0.5, %v924_v7  ;;  %v604_v10 = vrot.slane %v924_v7, 4 }
 0x25c   :  { %v601_v9 = vadd.f32 0.5, %v600_v8 }
 0x25e   :  { %v602_v12 = vmul.f32 %v601_v9, %v579_v51  ;;  %v606_v14 = vmul.f32 %v604_v10, %v601_v9  ;;  %v993_v10 = vmov 7  }
 0x260   :  { %v608_v15 = vrot.slane %v606_v14, 6  ;;  %v995_v14 = vmov 4  }
 0x262   :  { %v610_v16 = vadd.f32 %v608_v15, %v602_v12  ;;  %v994_v12 = vmov 3   ;;  %v996_v15 = vmov 5  }
 0x264   :  { %925 = vtanh.f32 %v610_v16 }
 0x26e   :  { %v926_v17 = vpop.eup %925 }
 0x26f   :  { %v613_v18 = vrot.slane %v926_v17, 4 }
 0x271   :  { %v615_v19 = vmul.f32 %v613_v18, %v601_v9  ;;  %v992_v9 = vmov 2  }
 0x273   :  { %v619_v40 = vrot.slane %v615_v19, 6  ;;  %v621_v20 = vrot.slane %v615_v19, 4  ;;  %v623_v21 = vrot.slane %v615_v19, 2  ;;  %616 = vst.msk [vmem:[#allocation2 - $0x1] sm:$0x40] %vm456_vm7, %v615_v19 }
 0x274   :  { %617 = vst.msk [vmem:[#allocation2 + $0x3] sm:$0x80] %vm458_vm8, %v615_v19 }
 0x275   :  { %v625_v1 = vsel %vm467_vm9, %v619_v40, %v621_v20 }
 0x276   :  { %v626_v2 = vsel %vm469_vm10, %v625_v1, %v623_v21 }
 0x277   :  { %v627_v3 = vsel %vm471_vm11, %v626_v2, %v615_v19 }
 0x278   :  { %v628_v22 = vmul.f32 %v627_v3, %v1068_v41 }
 0x27a   :  { %v629_v23 = vadd.f32 %v628_v22, %v429_v61 }
 0x27c   :  { %927 = vtanh.f32 %v629_v23 }
 0x286   :  { %v928_v24 = vpop.eup %927 }
 0x287   :  { %v631_v25 = vmul.f32 0.5, %v928_v24  ;;  %v635_v27 = vrot.slane %v928_v24, 4 }
 0x289   :  { %v632_v26 = vadd.f32 0.5, %v631_v25 }
 0x28b   :  { %v633_v28 = vmul.f32 %v632_v26, %v610_v16  ;;  %v637_v29 = vmul.f32 %v635_v27, %v632_v26  ;;  %v997_v16 = vmov 6  }
 0x28d   :  { %v639_v11 = vrot.slane %v637_v29, 6 }
 0x28f   :  { %v641_v30 = vadd.f32 %v639_v11, %v633_v28 }
 0x291   :  { %929 = vtanh.f32 %v641_v30 }
 0x29b   :  { %v930_v31 = vpop.eup %929 }
 0x29c   :  { %v644_v32 = vrot.slane %v930_v31, 4 }
 0x29e   :  { %v646_v33 = vmul.f32 %v644_v32, %v632_v26 }
 0x2a0   :  { %v650_v34 = vrot.slane %v646_v33, 6  ;;  %v652_v35 = vrot.slane %v646_v33, 4  ;;  %v654_v36 = vrot.slane %v646_v33, 2  ;;  %647 = vst.msk [vmem:[#allocation2] sm:$0x40] %vm456_vm7, %v646_v33 }
 0x2a1   :  { %648 = vst.msk [vmem:[#allocation2 + $0x2] sm:$0x80] %vm458_vm8, %v646_v33 }
 0x2a2   :  { %v656_v58 = vsel %vm467_vm9, %v650_v34, %v652_v35 }
 0x2a3   :  { %v657_v59 = vsel %vm469_vm10, %v656_v58, %v654_v36 }
 0x2a4   :  { %v658_v61 = vsel %vm471_vm11, %v657_v59, %v646_v33 }
 0x2a5   :  { %v659_v37 = vmul.f32 %v658_v61, %v1068_v41 }
 0x2a7   :  { %v660_v38 = vadd.f32 %v659_v37, %v430_v55  ;;  %v715_v55 = vstv %s1274_s3  ;;  %s998_s3 = smov [#allocation6]  }
 0x2a8   :  { %s851_s4 = sshll.u32 %s998_s3, 4  ;;  %s852_s4 = int_to_ptr.vmem [resolvable:$true] %s851_s4 }
 0x2a9   :  { %931 = vtanh.f32 %v660_v38  ;;  %s939_s9 = scalar_lea.vmem %s852_s4, 32  ;;  %p944_p1 = scmp.lt.s32.totalorder %s852_s4, %s852_s4 }
 0x2aa   :  { %p940_p0 = scmp.ne.s32.totalorder %s852_s4, %s939_s9  ;;  %p945_p2 = scmp.lt.s32.totalorder %s939_s9, %s939_s9 }
 0x2ac   :  { %p946_p3 = por %p945_p2, %p944_p1 }
 0x2ae   :  { %p947_p4 = pnand %p946_p3, %p940_p0 }
 0x2b3   :  { %v932_v39 = vpop.eup %931 }
 0x2b4   :  { %v662_v42 = vmul.f32 0.5, %v932_v39  ;;  %v666_v44 = vrot.slane %v932_v39, 4 }
 0x2b6   :  { %v663_v43 = vadd.f32 0.5, %v662_v42 }
 0x2b8   :  { %v664_v45 = vmul.f32 %v663_v43, %v641_v30  ;;  %v668_v46 = vmul.f32 %v666_v44, %v663_v43 }
 0x2ba   :  { %v670_v47 = vrot.slane %v668_v46, 6 }
 0x2bc   :  { %v672_v49 = vadd.f32 %v670_v47, %v664_v45 }
 0x2be   :  { %933 = vtanh.f32 %v672_v49 }
 0x2c8   :  { %v934_v51 = vpop.eup %933 }
 0x2c9   :  { %v675_v53 = vrot.slane %v934_v51, 4 }
 0x2cb   :  { %v677_v54 = vmul.f32 %v675_v53, %v663_v43 }
 0x2cd   :  { %678 = vst.msk [vmem:[#allocation2 + $0x1] sm:$0x40] %vm456_vm7, %v677_v54 }
 0x2ce   :  { %679 = vst.msk [vmem:[#allocation2 + $0x1] sm:$0x80] %vm458_vm8, %v677_v54 }
 0x2d4   :  { %v680_v41 = vld [vmem:[#allocation2] sm:$0xff] }
 0x2d5   :  { %v681_v48 = vld [vmem:[#allocation2 + $0x8] sm:$0xff] }
 0x2d6   :  { %v682_v50 = vadd.f32 %v681_v48, %v680_v41 }
 0x2d8   :  { %683 = vxpose.xlu1.b32.start.end [1/1] (short) (narrow) %v682_v50, 8 }
 0x2f6   :  { %892 = vset.pattern.permute.xlu1 %v991_v13 }
 0x358   :  { %v699_v56 = vpop.trf.xlu1 }
 0x359   :  { %v716_v57 = vadd.f32 %v715_v55, %v699_v56 }
 0x35b   :  { %v719_v60 = vsel %vm718_vm12, %v716_v57, -inf }
 0x35c   :  { %v721_v62 = vsel %vm720_vm13, %v719_v60, -inf }
 0x35d   :  { %722 = vmax.xlane.f32.xlu1 %v721_v62 }
 0x3ea   :  { %v723_v63 = vpop.xlane.xlu1 %722 }
 0x3eb   :  { %v724_v0 = vsub.f32 %v719_v60, %v723_v63 }
 0x3ed   :  { %v725_v4 = vmul.f32 1.442695, %v724_v0 }
 0x3ef   :  { %935 = vpow2.f32 %v725_v4 }
 0x3f9   :  { %v936_v13 = vpop.eup %935 }
 0x3fa   :  { %v727_v5 = vsel %vm720_vm13, %v936_v13, 0.0 }
 0x3fb   :  { %728 = vadd.xlane.f32.xlu0 %v727_v5 }
 0x488   :  { %v729_v6 = vpop.xlane.xlu0 %728 }
 0x489   :  { %937 = vrcp.f32 %v729_v6 }
 0x493   :  { %v938_v7 = vpop.eup %937 }
 0x494   :  { %v731_v8 = vmul.f32 %v938_v7, %v936_v13 }
 0x496   :  { %732 = vst.msk [vmem:[#allocation6] sm:$0x3] %vm720_vm13, %v731_v8  ;;  %747 = vperm.xlu0 %893, %v731_v8   ;;  %737 = vperm.xlu1 %892, %v731_v8  }
 0x49a   :  { %894 = vset.pattern.permute.xlu1 %v992_v9  ;;  %900 = vset.pattern.permute.xlu0 %v993_v10 }
 0x49b   :  { %759 = vperm.xlu1 %894, %v731_v8  }
 0x49f   :  { %895 = vset.pattern.permute.xlu1 %v994_v12 }
 0x4a0   :  { %771 = vperm.xlu1 %895, %v731_v8  }
 0x4a4   :  { %896 = vset.pattern.permute.xlu1 %v995_v14 }
 0x4a5   :  { %783 = vperm.xlu1 %896, %v731_v8  }
 0x4a9   :  { %897 = vset.pattern.permute.xlu1 %v996_v15 }
 0x4aa   :  { %795 = vperm.xlu1 %897, %v731_v8  }
 0x4ae   :  { %898 = vset.pattern.permute.xlu1 %v997_v16 }
 0x4af   :  { %807 = vperm.xlu1 %898, %v731_v8  }
 0x4b3   :  { %899 = vset.pattern.permute.xlu1 %v993_v10 }
 0x4b4   :  { %819 = vperm.xlu1 %899, %v731_v8  }
 0x4b5   :  { %950 = shalt.err (!%p947_p4)
}
 0x4b6   :  { %s951_s12 = scalar_lea.hbm %s1277_s6, 32 }
 0x4b7   :  { %p952_p5 = scmp.ne.s32.totalorder %s1277_s6, %s951_s12  ;;  %p955_p6 = scmp.lt.u32.totalorder %s951_s12, %s1277_s6 }
 0x4b9   :  { %p957_p7 = pnand %p955_p6, %p952_p5 }
 0x4bb   :  { %960 = shalt.err (!%p957_p7)
}
 0x4bc   :  { %854 = dma.vmem_to_hbm [thread:$0]  %s852_s4, 32, %s1277_s6, [#allocation7]   ;;  %v745_v2 = vld [vmem:[%s1271_s0 + $0x9] sm:$0x1]  ;;  %v734_v3 = vld [vmem:[%s1271_s0 + $0x8] sm:$0x1] }
 0x4bd   :  { %v744_v23 = vld [vmem:[%s1271_s0 + $0x1] sm:$0x1]  ;;  %v733_v24 = vld [vmem:[%s1271_s0] sm:$0x1]  ;;  %v757_v25 = vld [vmem:[%s1271_s0 + $0xa] sm:$0x1] }
 0x4be   :  { %v756_v29 = vld [vmem:[%s1271_s0 + $0x2] sm:$0x1]  ;;  %v769_v11 = vld [vmem:[%s1271_s0 + $0xb] sm:$0x1]  ;;  %v768_v35 = vld [vmem:[%s1271_s0 + $0x3] sm:$0x1] }
 0x4bf   :  { %v781_v36 = vld [vmem:[%s1271_s0 + $0xc] sm:$0x1]  ;;  %v780_v38 = vld [vmem:[%s1271_s0 + $0x4] sm:$0x1]  ;;  %v793_v39 = vld [vmem:[%s1271_s0 + $0xd] sm:$0x1] }
 0x4c0   :  { %v792_v47 = vld [vmem:[%s1271_s0 + $0x5] sm:$0x1]  ;;  %v805_v49 = vld [vmem:[%s1271_s0 + $0xe] sm:$0x1]  ;;  %v804_v50 = vld [vmem:[%s1271_s0 + $0x6] sm:$0x1] }
 0x4c1   :  { %v816_v60 = vld [vmem:[%s1271_s0 + $0x7] sm:$0x1]  ;;  %v817_v62 = vld [vmem:[%s1271_s0 + $0xf] sm:$0x1]  ;;  %s999_s22 = smov [#allocation4]   ;;  %vm833_vm14 = vcmask 254976  }
 0x4c2   :  { %s841_s23 = sshll.u32 %s999_s22, 4  ;;  %s842_s23 = int_to_ptr.vmem [resolvable:$true] %s841_s23 }
 0x4c3   :  { %s961_s0 = scalar_lea.vmem %s842_s23, 32  ;;  %p966_p9 = scmp.lt.s32.totalorder %s842_s23, %s842_s23 }
 0x4c4   :  { %p962_p8 = scmp.ne.s32.totalorder %s842_s23, %s961_s0  ;;  %p967_p10 = scmp.lt.s32.totalorder %s961_s0, %s961_s0 }
 0x4c6   :  { %p968_p11 = por %p967_p10, %p966_p9 }
 0x4c8   :  { %p969_p12 = pnand %p968_p11, %p962_p8 }
 0x515   :  { %v738_v17 = vpop.permute.xlu1 %737  ;;  %v748_v40 = vpop.permute.xlu0 %747 }
 0x516   :  { %v749_v20 = vrot.slane %v748_v40, 1  ;;  %v739_v21 = vrot.slane %v738_v17, 1  ;;  %v752_v31 = vmul.f32 %v748_v40, %v744_v23  ;;  %v742_v32 = vmul.f32 %v738_v17, %v733_v24 }
 0x518   :  { %v753_v26 = vmul.f32 %v749_v20, %v745_v2  ;;  %v743_v27 = vmul.f32 %v739_v21, %v734_v3  ;;  %v754_v42 = vmax.f32 %v742_v32, %v752_v31 }
 0x51a   :  { %v760_v18 = vpop.permute.xlu1 %759  ;;  %v755_v58 = vmax.f32 %v743_v27, %v753_v26 }
 0x51b   :  { %v761_v22 = vrot.slane %v760_v18, 1  ;;  %v764_v59 = vmul.f32 %v760_v18, %v756_v29 }
 0x51d   :  { %v765_v33 = vmul.f32 %v761_v22, %v757_v25  ;;  %v766_v53 = vmax.f32 %v754_v42, %v764_v59 }
 0x51f   :  { %v772_v19 = vpop.permute.xlu1 %771  ;;  %v767_v43 = vmax.f32 %v755_v58, %v765_v33 }
 0x520   :  { %v773_v28 = vrot.slane %v772_v19, 1  ;;  %v776_v44 = vmul.f32 %v772_v19, %v768_v35 }
 0x522   :  { %v777_v61 = vmul.f32 %v773_v28, %v769_v11  ;;  %v778_v52 = vmax.f32 %v766_v53, %v776_v44 }
 0x524   :  { %v784_v1 = vpop.permute.xlu1 %783  ;;  %v779_v54 = vmax.f32 %v767_v43, %v777_v61 }
 0x525   :  { %v785_v34 = vrot.slane %v784_v1, 1  ;;  %v788_v41 = vmul.f32 %v784_v1, %v780_v38 }
 0x527   :  { %v789_v45 = vmul.f32 %v785_v34, %v781_v36  ;;  %v790_v0 = vmax.f32 %v778_v52, %v788_v41 }
 0x529   :  { %v796_v30 = vpop.permute.xlu1 %795  ;;  %v791_v55 = vmax.f32 %v779_v54, %v789_v45 }
 0x52a   :  { %v797_v37 = vrot.slane %v796_v30, 1  ;;  %v800_v56 = vmul.f32 %v796_v30, %v792_v47 }
 0x52c   :  { %v801_v48 = vmul.f32 %v797_v37, %v793_v39  ;;  %v802_v6 = vmax.f32 %v790_v0, %v800_v56 }
 0x52e   :  { %v808_v46 = vpop.permute.xlu1 %807  ;;  %v803_v4 = vmax.f32 %v791_v55, %v801_v48 }
 0x52f   :  { %v809_v51 = vrot.slane %v808_v46, 1  ;;  %v812_v13 = vmul.f32 %v808_v46, %v804_v50 }
 0x531   :  { %v813_v57 = vmul.f32 %v809_v51, %v805_v49  ;;  %v814_v10 = vmax.f32 %v802_v6, %v812_v13 }
 0x533   :  { %v820_v63 = vpop.permute.xlu1 %819  ;;  %v815_v7 = vmax.f32 %v803_v4, %v813_v57 }
 0x534   :  { %v821_v5 = vrot.slane %v820_v63, 1  ;;  %v824_v8 = vmul.f32 %v820_v63, %v816_v60 }
 0x536   :  { %v825_v9 = vmul.f32 %v821_v5, %v817_v62  ;;  %v826_v14 = vmax.f32 %v814_v10, %v824_v8 }
 0x538   :  { %v827_v12 = vmax.f32 %v815_v7, %v825_v9 }
 0x53a   :  { %v830_v15 = vrot.slane %v827_v12, 7 }
 0x53c   :  { %v831_v16 = vsel %vm114_vm5, %v830_v15, %v826_v14 }
 0x53d   :  { %834 = vst.msk [vmem:[#allocation4] sm:$0x3] %vm833_vm14, %v831_v16 }
 0x53e   :  { %972 = shalt.err (!%p969_p12)
}
 0x53f   :  { %s973_s25 = scalar_lea.hbm %s1276_s5, 32 }
 0x540   :  { %p974_p13 = scmp.ne.s32.totalorder %s1276_s5, %s973_s25  ;;  %p977_p0 = scmp.lt.u32.totalorder %s973_s25, %s1276_s5 }
 0x542   :  { %p979_p1 = pnand %p977_p0, %p974_p13 }
 0x544   :  { %982 = shalt.err (!%p979_p1)
}
 0x545   :  { %844 = dma.vmem_to_hbm [thread:$0]  %s842_s23, 32, %s1276_s5, [#allocation5]  }
 0x546   :  { %983 = dma.done.wait [#allocation5], 32  }
 0x547   :  { %984 = vsyncadd [#allocation5], 4294967264 }
 0x548   :  { %985 = dma.done.wait [#allocation7], 32  }
 0x549   :  { %986 = vsyncadd [#allocation7], 4294967264 }
 0x54a   :  { %861 = vsyncpa [#allocation5], 1 }
 0x54b   :  { %862 = vsyncpa [#allocation7], 1 }

</bundles_post_ra>
